<compile_context>
chip_gen: v7x
topology: tpu7x:2x2x1
jax: 0.10.0
libtpu: 0.0.40
codegen_flags: <defaults>
</compile_context>

<pallas_src>
import functools

import jax
import jax.numpy as jnp
from jax.experimental import pallas as pl
from jax.experimental.pallas import tpu as pltpu


# ------------------------------- helpers -----------------------------------

def _cp_parallel():
    return pltpu.CompilerParams(dimension_semantics=("parallel",))


def _row_grid(n, max_tile=256):
    """Row tile + grid size; cdiv grid (no exact-divisor requirement)."""
    if n <= max_tile:
        return n, 1
    return max_tile, pl.cdiv(n, max_tile)


def _ln(x, g, b, eps=1e-5):
    mu = jnp.mean(x, axis=-1, keepdims=True)
    var = jnp.mean(jnp.square(x - mu), axis=-1, keepdims=True)
    return (x - mu) * jax.lax.rsqrt(var + eps) * g + b


# ------------------------ fused encoder-layer kernel ------------------------

def _clip_layer_kernel(num_heads, with_mask, *refs):
    """Full CLIPEncoderLayer for one batch element, entirely in VMEM.

    LN1 -> fused QKV proj -> per-head attention (ctx merged into a VMEM
    scratch slice, no concat) -> output proj + residual -> LN2 ->
    quick_gelu MLP -> residual.
    """
    if with_mask:
        (x_ref, am_ref, ln1g_ref, ln1b_ref, wqkv_ref, bqkv_ref, wo_ref,
         bo_ref, ln2g_ref, ln2b_ref, w1_ref, b1_ref, w2_ref, b2_ref,
         o_ref, ctx_ref) = refs
    else:
        (x_ref, ln1g_ref, ln1b_ref, wqkv_ref, bqkv_ref, wo_ref,
         bo_ref, ln2g_ref, ln2b_ref, w1_ref, b1_ref, w2_ref, b2_ref,
         o_ref, ctx_ref) = refs

    x = x_ref[...]                                     # (L, D) f32
    L, D = x.shape
    Dh = D // num_heads

    # LN1 + fused QKV projection (q scale folded into wqkv/bqkv offline).
    h = _ln(x, ln1g_ref[...], ln1b_ref[...])
    qkv = jnp.dot(h.astype(jnp.bfloat16), wqkv_ref[...],
                  preferred_element_type=jnp.float32) + bqkv_ref[...]

    # Additive attention bias (causal + key padding), built in-kernel.
    if with_mask:
        am = am_ref[...]                               # (1, L); 1=valid 0=pad
        row = jax.lax.broadcasted_iota(jnp.int32, (L, L), 0)
        col = jax.lax.broadcasted_iota(jnp.int32, (L, L), 1)
        neg = jnp.float32(-1e9)
        bias = jnp.where(col <= row, jnp.float32(0.0), neg) + (1.0 - am) * neg

    # Per-head attention; ctx merged via VMEM scratch columns (no lane concat,
    # no H live ctx tensors).  qkv / scores / ctx never leave VMEM.
    for hh in range(num_heads):
        qh = qkv[:, hh * Dh:(hh + 1) * Dh].astype(jnp.bfloat16)
        kh = qkv[:, D + hh * Dh:D + (hh + 1) * Dh].astype(jnp.bfloat16)
        vh = qkv[:, 2 * D + hh * Dh:2 * D + (hh + 1) * Dh].astype(jnp.bfloat16)
        s = jax.lax.dot_general(qh, kh, (((1,), (1,)), ((), ())),
                                preferred_element_type=jnp.float32)  # (L, L)
        if with_mask:
            s = s + bias
        s = s - jnp.max(s, axis=-1, keepdims=True)
        p = jnp.exp(s)
        p = p * pl.reciprocal(jnp.sum(p, axis=-1, keepdims=True), approx=True)
        ctx_ref[:, hh * Dh:(hh + 1) * Dh] = jnp.dot(
            p.astype(jnp.bfloat16), vh, preferred_element_type=jnp.float32)

    # Output projection: one contiguous (L,D)x(D,D) MXU matmul + residual.
    attn = jnp.dot(ctx_ref[...].astype(jnp.bfloat16), wo_ref[...],
                   preferred_element_type=jnp.float32) + bo_ref[...]
    x = x + attn

    # LN2 + quick_gelu MLP + residual.
    h2 = _ln(x, ln2g_ref[...], ln2b_ref[...])
    h1 = jnp.dot(h2.astype(jnp.bfloat16), w1_ref[...],
                 preferred_element_type=jnp.float32) + b1_ref[...]
    h1 = h1 * jax.nn.sigmoid(1.702 * h1)               # quick_gelu
    mlp = jnp.dot(h1.astype(jnp.bfloat16), w2_ref[...],
                  preferred_element_type=jnp.float32) + b2_ref[...]
    o_ref[...] = x + mlp


def pallas_clip_layer(x, am, lp, num_heads, with_mask):
    """HF CLIPEncoderLayer as a single fused pallas_call (grid over batch)."""
    B, L, D = x.shape
    D3 = 3 * D
    Dm = lp['w1'].shape[1]
    kernel = functools.partial(_clip_layer_kernel, num_heads, with_mask)

    def resident(shape):
        # Weights: same block every grid step (kept resident in VMEM).
        return pl.BlockSpec(shape, lambda b: (0,) * len(shape))

    in_specs = [pl.BlockSpec((None, L, D), lambda b: (b, 0, 0))]   # squeezed B
    inputs = [x]
    if with_mask:
        in_specs.append(pl.BlockSpec((None, 1, L), lambda b: (b, 0, 0)))
        inputs.append(am)
    in_specs += [resident((1, D)), resident((1, D)),        # ln1 g, b
                 resident((D, D3)), resident((1, D3)),      # wqkv, bqkv
                 resident((D, D)), resident((1, D)),        # wo, bo
                 resident((1, D)), resident((1, D)),        # ln2 g, b
                 resident((D, Dm)), resident((1, Dm)),      # w1, b1
                 resident((Dm, D)), resident((1, D))]       # w2, b2
    inputs += [lp['ln1_g'], lp['ln1_b'], lp['wqkv'], lp['bqkv'],
               lp['wo'], lp['bo'], lp['ln2_g'], lp['ln2_b'],
               lp['w1'], lp['b1'], lp['w2'], lp['b2']]

    return pl.pallas_call(
        kernel,
        out_shape=jax.ShapeDtypeStruct((B, L, D), jnp.float32),
        grid=(B,),
        in_specs=in_specs,
        out_specs=pl.BlockSpec((None, L, D), lambda b: (b, 0, 0)),
        scratch_shapes=[pltpu.VMEM((L, D), jnp.float32)],   # head-merge buffer
        compiler_params=pltpu.CompilerParams(
            dimension_semantics=("parallel",),
            vmem_limit_bytes=32 * 1024 * 1024),
    )(*inputs)


# --------------------------- small helper kernels ---------------------------

def _layernorm_kernel(x_ref, g_ref, b_ref, o_ref):
    o_ref[...] = _ln(x_ref[...], g_ref[...], b_ref[...])


def pallas_layernorm(x, g, b):
    N, D = x.shape
    tn, gsz = _row_grid(N)
    return pl.pallas_call(
        _layernorm_kernel,
        out_shape=jax.ShapeDtypeStruct((N, D), jnp.float32),
        grid=(gsz,),
        in_specs=[pl.BlockSpec((tn, D), lambda i: (i, 0)),
                  pl.BlockSpec((1, D), lambda i: (0, 0)),
                  pl.BlockSpec((1, D), lambda i: (0, 0))],
        out_specs=pl.BlockSpec((tn, D), lambda i: (i, 0)),
        compiler_params=_cp_parallel(),
    )(x, g, b)


def _linear_nobias_kernel(x_ref, w_ref, o_ref):
    o_ref[...] = jnp.dot(x_ref[...].astype(jnp.bfloat16), w_ref[...],
                         preferred_element_type=jnp.float32)


def pallas_linear_nobias(x, w):
    N, Din = x.shape
    Dout = w.shape[1]
    tn, gsz = _row_grid(N)
    return pl.pallas_call(
        _linear_nobias_kernel,
        out_shape=jax.ShapeDtypeStruct((N, Dout), jnp.float32),
        grid=(gsz,),
        in_specs=[pl.BlockSpec((tn, Din), lambda i: (i, 0)),
                  pl.BlockSpec((Din, Dout), lambda i: (0, 0))],
        out_specs=pl.BlockSpec((tn, Dout), lambda i: (i, 0)),
        compiler_params=_cp_parallel(),
    )(x, w)


def _ln_proj_l2norm_kernel(x_ref, g_ref, b_ref, w_ref, o_ref):
    """Final LN + projection (no bias) + L2 normalization, fused."""
    h = _ln(x_ref[...], g_ref[...], b_ref[...])
    e = jnp.dot(h.astype(jnp.bfloat16), w_ref[...],
                preferred_element_type=jnp.float32)
    o_ref[...] = e * jax.lax.rsqrt(jnp.sum(e * e, axis=-1, keepdims=True))


def pallas_ln_proj_l2norm(x, g, b, w):
    N, D = x.shape
    P = w.shape[1]
    return pl.pallas_call(
        _ln_proj_l2norm_kernel,
        out_shape=jax.ShapeDtypeStruct((N, P), jnp.float32),
        grid=(1,),
        in_specs=[pl.BlockSpec((N, D), lambda i: (0, 0)),
                  pl.BlockSpec((1, D), lambda i: (0, 0)),
                  pl.BlockSpec((1, D), lambda i: (0, 0)),
                  pl.BlockSpec((D, P), lambda i: (0, 0))],
        out_specs=pl.BlockSpec((N, P), lambda i: (0, 0)),
    )(x, g, b, w)


# --------------------------- CLIP building blocks ---------------------------

def text_encoder(input_ids, attention_mask, p):
    B, L = input_ids.shape
    # Token gather + positional add stays in XLA (data-dependent gather).
    x = jnp.take(p['tok_emb'], input_ids, axis=0) + p['pos_emb'][None, :L]
    am = attention_mask.astype(jnp.float32).reshape(B, 1, L)

    for lp in p['layers']:
        x = pallas_clip_layer(x, am, lp, p['num_heads'], with_mask=True)

    # HF CLIP eos pooling (argmax of token ids); final LN is per-token, so it
    # commutes with the gather -> fuse final LN + text_projection + L2 norm.
    pool_idx = jnp.argmax(input_ids, axis=-1)
    pooled = x[jnp.arange(B), pool_idx]                        # (B, D)
    return pallas_ln_proj_l2norm(pooled, p['lnf_g'], p['lnf_b'],
                                 p['text_proj'])


def vision_encoder(pixel_values, p):
    B, C, H, W = pixel_values.shape                  # NCHW, like PyTorch
    ph = pw = p['patch']
    gh, gw = H // ph, W // pw
    D = p['cls_emb'].shape[0]

    # stride=patch conv == unfold into (C*ph*pw) patch vectors + matmul.
    patches = pixel_values.reshape(B, C, gh, ph, gw, pw)
    patches = patches.transpose(0, 2, 4, 1, 3, 5).reshape(B * gh * gw,
                                                          C * ph * pw)
    pe = pallas_linear_nobias(patches, p['patch_w']).reshape(B, gh * gw, D)
    cls = jnp.broadcast_to(p['cls_emb'][None, None, :], (B, 1, D))
    x = jnp.concatenate([cls, pe], axis=1) + p['pos_emb'][None]
    L = x.shape[1]

    x = pallas_layernorm(x.reshape(B * L, D),
                         p['ln_pre_g'], p['ln_pre_b']).reshape(B, L, D)
    for lp in p['layers']:
        x = pallas_clip_layer(x, None, lp, p['num_heads'], with_mask=False)
    pooled = x[:, 0]                                  # CLS token
    return pallas_ln_proj_l2norm(pooled, p['ln_post_g'], p['ln_post_b'],
                                 p['visual_proj'])


def clip_onnx_wrapper_forward(params, input_ids, attention_mask, pixel_values):
    """Matches CLIPONNXWrapper.forward: returns (text_embeds, image_embeds)."""
    text_embeds = text_encoder(input_ids, attention_mask, params['text'])
    image_embeds = vision_encoder(pixel_values, params['vision'])
    return text_embeds, image_embeds


# ------------------------------ parameter init ------------------------------

def init_clip_params(key, *, vocab=64, max_len=8, d_text=32, text_heads=4,
                     text_layers=2, text_mlp=64, img_size=16, patch=8,
                     channels=3, d_vis=32, vis_heads=4, vis_layers=2,
                     vis_mlp=64, proj_dim=32):
    keys = iter(jax.random.split(key, 256))

    def nrm(shape, s=0.02):
        return jax.random.normal(next(keys), shape, jnp.float32) * s

    def layer_params(d, mlp):
        return dict(
            ln1_g=jnp.ones((d,), jnp.float32), ln1_b=jnp.zeros((d,), jnp.float32),
            wq=nrm((d, d)), bq=jnp.zeros((d,), jnp.float32),
            wk=nrm((d, d)), bk=jnp.zeros((d,), jnp.float32),
            wv=nrm((d, d)), bv=jnp.zeros((d,), jnp.float32),
            wo=nrm((d, d)), bo=jnp.zeros((d,), jnp.float32),
            ln2_g=jnp.ones((d,), jnp.float32), ln2_b=jnp.zeros((d,), jnp.float32),
            w1=nrm((d, mlp)), b1=jnp.zeros((mlp,), jnp.float32),
            w2=nrm((mlp, d)), b2=jnp.zeros((d,), jnp.float32),
        )

    text = dict(
        tok_emb=nrm((vocab, d_text)),
        pos_emb=nrm((max_len, d_text)),
        layers=[layer_params(d_text, text_mlp) for _ in range(text_layers)],
        lnf_g=jnp.ones((d_text,), jnp.float32),
        lnf_b=jnp.zeros((d_text,), jnp.float32),
        text_proj=nrm((d_text, proj_dim)),
        num_heads=text_heads,
    )
    num_patches = (img_size // patch) ** 2
    vision = dict(
        patch=patch,
        patch_w=nrm((channels * patch * patch, d_vis)),   # conv as matmul
        cls_emb=nrm((d_vis,)),
        pos_emb=nrm((num_patches + 1, d_vis)),
        ln_pre_g=jnp.ones((d_vis,), jnp.float32),
        ln_pre_b=jnp.zeros((d_vis,), jnp.float32),
        layers=[layer_params(d_vis, vis_mlp) for _ in range(vis_layers)],
        ln_post_g=jnp.ones((d_vis,), jnp.float32),
        ln_post_b=jnp.zeros((d_vis,), jnp.float32),
        visual_proj=nrm((d_vis, proj_dim)),
        num_heads=vis_heads,
    )
    return dict(text=text, vision=vision)


def _prep_layer(lp, num_heads):
    """Offline weight prep: fuse QKV, fold q scale, cast matmul weights bf16,
    reshape vectors to (1, D) rows for direct in-kernel broadcasting."""
    d = lp['wq'].shape[0]
    dm = lp['w1'].shape[1]
    scale = (d // num_heads) ** -0.5
    return dict(
        ln1_g=lp['ln1_g'].reshape(1, d), ln1_b=lp['ln1_b'].reshape(1, d),
        wqkv=jnp.concatenate([lp['wq'] * scale, lp['wk'], lp['wv']],
                             axis=1).astype(jnp.bfloat16),
        bqkv=jnp.concatenate([lp['bq'] * scale, lp['bk'], lp['bv']],
                             axis=0).reshape(1, 3 * d),
        wo=lp['wo'].astype(jnp.bfloat16), bo=lp['bo'].reshape(1, d),
        ln2_g=lp['ln2_g'].reshape(1, d), ln2_b=lp['ln2_b'].reshape(1, d),
        w1=lp['w1'].astype(jnp.bfloat16), b1=lp['b1'].reshape(1, dm),
        w2=lp['w2'].astype(jnp.bfloat16), b2=lp['b2'].reshape(1, d),
    )


def prepare_params(p):
    t, v = p['text'], p['vision']
    dt = t['tok_emb'].shape[1]
    dv = v['cls_emb'].shape[0]
    text = dict(
        tok_emb=t['tok_emb'], pos_emb=t['pos_emb'],
        layers=[_prep_layer(lp, t['num_heads']) for lp in t['layers']],
        lnf_g=t['lnf_g'].reshape(1, dt), lnf_b=t['lnf_b'].reshape(1, dt),
        text_proj=t['text_proj'].astype(jnp.bfloat16),
        num_heads=t['num_heads'],
    )
    vision = dict(
        patch=v['patch'],
        patch_w=v['patch_w'].astype(jnp.bfloat16),
        cls_emb=v['cls_emb'], pos_emb=v['pos_emb'],
        ln_pre_g=v['ln_pre_g'].reshape(1, dv),
        ln_pre_b=v['ln_pre_b'].reshape(1, dv),
        layers=[_prep_layer(lp, v['num_heads']) for lp in v['layers']],
        ln_post_g=v['ln_post_g'].reshape(1, dv),
        ln_post_b=v['ln_post_b'].reshape(1, dv),
        visual_proj=v['visual_proj'].astype(jnp.bfloat16),
        num_heads=v['num_heads'],
    )
    return dict(text=text, vision=vision)


# ----------------------------------- main -----------------------------------

if __name__ == "__main__":
    key = jax.random.PRNGKey(0)
    kp, k_ids, k_px = jax.random.split(key, 3)
    params = prepare_params(init_clip_params(kp))

    B, L = 2, 8
    input_ids = jax.random.randint(k_ids, (B, L), 1, 64).astype(jnp.int32)
    attention_mask = jnp.ones((B, L), jnp.int32)
    pixel_values = jax.random.normal(k_px, (B, 3, 16, 16), jnp.float32)

    fwd = jax.jit(lambda ids, am, px: clip_onnx_wrapper_forward(params, ids, am, px))
    text_embeds, image_embeds = fwd(input_ids, attention_mask, pixel_values)
    jax.block_until_ready((text_embeds, image_embeds))

    assert text_embeds.shape == (B, 32), text_embeds.shape
    assert image_embeds.shape == (B, 32), image_embeds.shape
    assert bool(jnp.all(jnp.isfinite(text_embeds)))
    assert bool(jnp.all(jnp.isfinite(image_embeds)))
    # L2-normalized outputs, as CLIPModel returns in CLIPOutput
    assert bool(jnp.allclose(jnp.linalg.norm(text_embeds, axis=-1), 1.0, atol=1e-4))
    assert bool(jnp.allclose(jnp.linalg.norm(image_embeds, axis=-1), 1.0, atol=1e-4))
    print("KERNEL_OK")
</pallas_src>

<mosaic_0001>
module attributes {stable_mosaic.version = 11 : i64} {
  func.func @_linear_nobias_kernel(%arg0: i32, %arg1: memref<8x192xf32, #tpu.memory_space<vmem>>, %arg2: memref<192x32xbf16, #tpu.memory_space<vmem>>, %arg3: memref<8x32xf32, #tpu.memory_space<vmem>>) attributes {dimension_semantics = [#tpu.dimension_semantics<parallel>], iteration_bounds = array<i64: 1>, scalar_prefetch = 0 : i64, scratch_operands = 0 : i64, tpu.core_type = #tpu.core_type<tc>, window_params = [{transform_indices = @transform_0, window_bounds = array<i64: 8, 192>}, {pipeline_mode = #tpu.pipeline_mode<synchronous>, transform_indices = @transform_1, window_bounds = array<i64: 192, 32>}, {transform_indices = @transform_2, window_bounds = array<i64: 8, 32>}]} {
    %c0 = arith.constant 0 : index
    %c0_0 = arith.constant 0 : index
    %0 = vector.load %arg1[%c0, %c0_0] : memref<8x192xf32, #tpu.memory_space<vmem>>, vector<8x192xf32>
    %1 = arith.truncf %0 : vector<8x192xf32> to vector<8x192xbf16>
    %c0_1 = arith.constant 0 : index
    %c0_2 = arith.constant 0 : index
    %2 = vector.load %arg2[%c0_1, %c0_2] : memref<192x32xbf16, #tpu.memory_space<vmem>>, vector<192x32xbf16>
    %cst = arith.constant dense<0.000000e+00> : vector<8x32xf32>
    %3 = tpu.matmul %1, %2, %cst {dimension_numbers = #tpu.dot_dimension_numbers<[1], [0], [0], [1], [0, 0, 1, 1], [], []>} : vector<8x192xbf16>, vector<192x32xbf16>, vector<8x32xf32> -> vector<8x32xf32>
    %c0_3 = arith.constant 0 : index
    %c0_4 = arith.constant 0 : index
    %4 = vector.load %arg3[%c0_3, %c0_4] : memref<8x32xf32, #tpu.memory_space<vmem>>, vector<8x32xf32>
    tpu.vector_store %arg3[%c0_3, %c0_4], %3 {strides = array<i32>} : memref<8x32xf32, #tpu.memory_space<vmem>>, vector<8x32xf32>,
    return
  }
  func.func @transform_0(%arg0: i32) -> (i32, i32) {
    %c0_i32 = arith.constant 0 : i32
    %c0_i32_0 = arith.constant 0 : i32
    return %arg0, %c0_i32 : i32, i32
  }
  func.func @transform_1(%arg0: i32) -> (i32, i32) {
    %c0_i32 = arith.constant 0 : i32
    %c0_i32_0 = arith.constant 0 : i32
    %c0_i32_1 = arith.constant 0 : i32
    return %c0_i32, %c0_i32_0 : i32, i32
  }
  func.func @transform_2(%arg0: i32) -> (i32, i32) {
    %c0_i32 = arith.constant 0 : i32
    %c0_i32_0 = arith.constant 0 : i32
    return %arg0, %c0_i32 : i32, i32
  }
}

module attributes {stable_mosaic.version = 11 : i64} {
  func.func @_layernorm_kernel(%arg0: i32, %arg1: memref<10x32xf32, #tpu.memory_space<vmem>>, %arg2: memref<1x32xf32, #tpu.memory_space<vmem>>, %arg3: memref<1x32xf32, #tpu.memory_space<vmem>>, %arg4: memref<10x32xf32, #tpu.memory_space<vmem>>) attributes {dimension_semantics = [#tpu.dimension_semantics<parallel>], iteration_bounds = array<i64: 1>, scalar_prefetch = 0 : i64, scratch_operands = 0 : i64, tpu.core_type = #tpu.core_type<tc>, window_params = [{transform_indices = @transform_0, window_bounds = array<i64: 10, 32>}, {pipeline_mode = #tpu.pipeline_mode<synchronous>, transform_indices = @transform_1, window_bounds = array<i64: 1, 32>}, {pipeline_mode = #tpu.pipeline_mode<synchronous>, transform_indices = @transform_2, window_bounds = array<i64: 1, 32>}, {transform_indices = @transform_3, window_bounds = array<i64: 10, 32>}]} {
    %c0 = arith.constant 0 : index
    %c0_0 = arith.constant 0 : index
    %0 = vector.load %arg1[%c0, %c0_0] : memref<10x32xf32, #tpu.memory_space<vmem>>, vector<10x32xf32>
    %c0_1 = arith.constant 0 : index
    %c0_2 = arith.constant 0 : index
    %1 = vector.load %arg2[%c0_1, %c0_2] : memref<1x32xf32, #tpu.memory_space<vmem>>, vector<1x32xf32>
    %c0_3 = arith.constant 0 : index
    %c0_4 = arith.constant 0 : index
    %2 = vector.load %arg3[%c0_3, %c0_4] : memref<1x32xf32, #tpu.memory_space<vmem>>, vector<1x32xf32>
    %cst = arith.constant dense<0.000000e+00> : vector<10xf32>
    %3 = vector.multi_reduction <add>, %0, %cst [1] : vector<10x32xf32> to vector<10xf32>
    %4 = vector.shape_cast %3 : vector<10xf32> to vector<10x1xf32>
    %cst_5 = arith.constant 3.200000e+01 : f32
    %5 = vector.broadcast %cst_5 : f32 to vector<10x1xf32>
    %6 = arith.divf %4, %5 : vector<10x1xf32>
    %7 = vector.broadcast %6 : vector<10x1xf32> to vector<10x32xf32>
    %8 = arith.subf %0, %7 : vector<10x32xf32>
    %9 = arith.mulf %8, %8 : vector<10x32xf32>
    %cst_6 = arith.constant dense<0.000000e+00> : vector<10xf32>
    %10 = vector.multi_reduction <add>, %9, %cst_6 [1] : vector<10x32xf32> to vector<10xf32>
    %11 = vector.shape_cast %10 : vector<10xf32> to vector<10x1xf32>
    %cst_7 = arith.constant 3.200000e+01 : f32
    %12 = vector.broadcast %cst_7 : f32 to vector<10x1xf32>
    %13 = arith.divf %11, %12 : vector<10x1xf32>
    %14 = vector.broadcast %6 : vector<10x1xf32> to vector<10x32xf32>
    %15 = arith.subf %0, %14 : vector<10x32xf32>
    %cst_8 = arith.constant 9.99999974E-6 : f32
    %16 = vector.broadcast %cst_8 : f32 to vector<10x1xf32>
    %17 = arith.addf %13, %16 : vector<10x1xf32>
    %18 = math.rsqrt %17 : vector<10x1xf32>
    %19 = vector.broadcast %18 : vector<10x1xf32> to vector<10x32xf32>
    %20 = arith.mulf %15, %19 : vector<10x32xf32>
    %21 = vector.broadcast %1 : vector<1x32xf32> to vector<10x32xf32>
    %22 = arith.mulf %20, %21 : vector<10x32xf32>
    %23 = vector.broadcast %2 : vector<1x32xf32> to vector<10x32xf32>
    %24 = arith.addf %22, %23 : vector<10x32xf32>
    %c0_9 = arith.constant 0 : index
    %c0_10 = arith.constant 0 : index
    %25 = vector.load %arg4[%c0_9, %c0_10] : memref<10x32xf32, #tpu.memory_space<vmem>>, vector<10x32xf32>
    tpu.vector_store %arg4[%c0_9, %c0_10], %24 {strides = array<i32>} : memref<10x32xf32, #tpu.memory_space<vmem>>, vector<10x32xf32>,
    return
  }
  func.func @transform_0(%arg0: i32) -> (i32, i32) {
    %c0_i32 = arith.constant 0 : i32
    %c0_i32_0 = arith.constant 0 : i32
    return %arg0, %c0_i32 : i32, i32
  }
  func.func @transform_1(%arg0: i32) -> (i32, i32) {
    %c0_i32 = arith.constant 0 : i32
    %c0_i32_0 = arith.constant 0 : i32
    %c0_i32_1 = arith.constant 0 : i32
    return %c0_i32, %c0_i32_0 : i32, i32
  }
  func.func @transform_2(%arg0: i32) -> (i32, i32) {
    %c0_i32 = arith.constant 0 : i32
    %c0_i32_0 = arith.constant 0 : i32
    %c0_i32_1 = arith.constant 0 : i32
    return %c0_i32, %c0_i32_0 : i32, i32
  }
  func.func @transform_3(%arg0: i32) -> (i32, i32) {
    %c0_i32 = arith.constant 0 : i32
    %c0_i32_0 = arith.constant 0 : i32
    return %arg0, %c0_i32 : i32, i32
  }
}

module attributes {stable_mosaic.version = 11 : i64} {
  func.func @_clip_layer_kernel(%arg0: i32, %arg1: memref<1x5x32xf32, #tpu.memory_space<vmem>>, %arg2: memref<1x32xf32, #tpu.memory_space<vmem>>, %arg3: memref<1x32xf32, #tpu.memory_space<vmem>>, %arg4: memref<32x96xbf16, #tpu.memory_space<vmem>>, %arg5: memref<1x96xf32, #tpu.memory_space<vmem>>, %arg6: memref<32x32xbf16, #tpu.memory_space<vmem>>, %arg7: memref<1x32xf32, #tpu.memory_space<vmem>>, %arg8: memref<1x32xf32, #tpu.memory_space<vmem>>, %arg9: memref<1x32xf32, #tpu.memory_space<vmem>>, %arg10: memref<32x64xbf16, #tpu.memory_space<vmem>>, %arg11: memref<1x64xf32, #tpu.memory_space<vmem>>, %arg12: memref<64x32xbf16, #tpu.memory_space<vmem>>, %arg13: memref<1x32xf32, #tpu.memory_space<vmem>>, %arg14: memref<1x5x32xf32, #tpu.memory_space<vmem>>, %arg15: memref<5x32xf32, #tpu.memory_space<vmem>>) attributes {dimension_semantics = [#tpu.dimension_semantics<parallel>], iteration_bounds = array<i64: 2>, scalar_prefetch = 0 : i64, scratch_operands = 1 : i64, tpu.core_type = #tpu.core_type<tc>, window_params = [{transform_indices = @transform_0, window_bounds = array<i64: 1, 5, 32>}, {pipeline_mode = #tpu.pipeline_mode<synchronous>, transform_indices = @transform_1, window_bounds = array<i64: 1, 32>}, {pipeline_mode = #tpu.pipeline_mode<synchronous>, transform_indices = @transform_2, window_bounds = array<i64: 1, 32>}, {pipeline_mode = #tpu.pipeline_mode<synchronous>, transform_indices = @transform_3, window_bounds = array<i64: 32, 96>}, {pipeline_mode = #tpu.pipeline_mode<synchronous>, transform_indices = @transform_4, window_bounds = array<i64: 1, 96>}, {pipeline_mode = #tpu.pipeline_mode<synchronous>, transform_indices = @transform_5, window_bounds = array<i64: 32, 32>}, {pipeline_mode = #tpu.pipeline_mode<synchronous>, transform_indices = @transform_6, window_bounds = array<i64: 1, 32>}, {pipeline_mode = #tpu.pipeline_mode<synchronous>, transform_indices = @transform_7, window_bounds = array<i64: 1, 32>}, {pipeline_mode = #tpu.pipeline_mode<synchronous>, transform_indices = @transform_8, window_bounds = array<i64: 1, 32>}, {pipeline_mode = #tpu.pipeline_mode<synchronous>, transform_indices = @transform_9, window_bounds = array<i64: 32, 64>}, {pipeline_mode = #tpu.pipeline_mode<synchronous>, transform_indices = @transform_10, window_bounds = array<i64: 1, 64>}, {pipeline_mode = #tpu.pipeline_mode<synchronous>, transform_indices = @transform_11, window_bounds = array<i64: 64, 32>}, {pipeline_mode = #tpu.pipeline_mode<synchronous>, transform_indices = @transform_12, window_bounds = array<i64: 1, 32>}, {transform_indices = @transform_13, window_bounds = array<i64: 1, 5, 32>}]} {
    %c0 = arith.constant 0 : index
    %c0_0 = arith.constant 0 : index
    %c0_1 = arith.constant 0 : index
    %0 = vector.load %arg1[%c0, %c0_0, %c0_1] : memref<1x5x32xf32, #tpu.memory_space<vmem>>, vector<1x5x32xf32>
    %1 = vector.shape_cast %0 : vector<1x5x32xf32> to vector<5x32xf32>
    %c0_2 = arith.constant 0 : index
    %c0_3 = arith.constant 0 : index
    %2 = vector.load %arg2[%c0_2, %c0_3] : memref<1x32xf32, #tpu.memory_space<vmem>>, vector<1x32xf32>
    %c0_4 = arith.constant 0 : index
    %c0_5 = arith.constant 0 : index
    %3 = vector.load %arg3[%c0_4, %c0_5] : memref<1x32xf32, #tpu.memory_space<vmem>>, vector<1x32xf32>
    %cst = arith.constant dense<0.000000e+00> : vector<5xf32>
    %4 = vector.multi_reduction <add>, %1, %cst [1] : vector<5x32xf32> to vector<5xf32>
    %5 = vector.shape_cast %4 : vector<5xf32> to vector<5x1xf32>
    %cst_6 = arith.constant 3.200000e+01 : f32
    %6 = vector.broadcast %cst_6 : f32 to vector<5x1xf32>
    %7 = arith.divf %5, %6 : vector<5x1xf32>
    %8 = vector.broadcast %7 : vector<5x1xf32> to vector<5x32xf32>
    %9 = arith.subf %1, %8 : vector<5x32xf32>
    %10 = arith.mulf %9, %9 : vector<5x32xf32>
    %cst_7 = arith.constant dense<0.000000e+00> : vector<5xf32>
    %11 = vector.multi_reduction <add>, %10, %cst_7 [1] : vector<5x32xf32> to vector<5xf32>
    %12 = vector.shape_cast %11 : vector<5xf32> to vector<5x1xf32>
    %cst_8 = arith.constant 3.200000e+01 : f32
    %13 = vector.broadcast %cst_8 : f32 to vector<5x1xf32>
    %14 = arith.divf %12, %13 : vector<5x1xf32>
    %15 = vector.broadcast %7 : vector<5x1xf32> to vector<5x32xf32>
    %16 = arith.subf %1, %15 : vector<5x32xf32>
    %cst_9 = arith.constant 9.99999974E-6 : f32
    %17 = vector.broadcast %cst_9 : f32 to vector<5x1xf32>
    %18 = arith.addf %14, %17 : vector<5x1xf32>
    %19 = math.rsqrt %18 : vector<5x1xf32>
    %20 = vector.broadcast %19 : vector<5x1xf32> to vector<5x32xf32>
    %21 = arith.mulf %16, %20 : vector<5x32xf32>
    %22 = vector.broadcast %2 : vector<1x32xf32> to vector<5x32xf32>
    %23 = arith.mulf %21, %22 : vector<5x32xf32>
    %24 = vector.broadcast %3 : vector<1x32xf32> to vector<5x32xf32>
    %25 = arith.addf %23, %24 : vector<5x32xf32>
    %26 = arith.truncf %25 : vector<5x32xf32> to vector<5x32xbf16>
    %c0_10 = arith.constant 0 : index
    %c0_11 = arith.constant 0 : index
    %27 = vector.load %arg4[%c0_10, %c0_11] : memref<32x96xbf16, #tpu.memory_space<vmem>>, vector<32x96xbf16>
    %cst_12 = arith.constant dense<0.000000e+00> : vector<5x96xf32>
    %28 = tpu.matmul %26, %27, %cst_12 {dimension_numbers = #tpu.dot_dimension_numbers<[1], [0], [0], [1], [0, 0, 1, 1], [], []>} : vector<5x32xbf16>, vector<32x96xbf16>, vector<5x96xf32> -> vector<5x96xf32>
    %c0_13 = arith.constant 0 : index
    %c0_14 = arith.constant 0 : index
    %29 = vector.load %arg5[%c0_13, %c0_14] : memref<1x96xf32, #tpu.memory_space<vmem>>, vector<1x96xf32>
    %30 = vector.broadcast %29 : vector<1x96xf32> to vector<5x96xf32>
    %31 = arith.addf %28, %30 : vector<5x96xf32>
    %32 = vector.extract_strided_slice %31 {offsets = [0, 0], sizes = [5, 8], strides = [1, 1]} : vector<5x96xf32> to vector<5x8xf32>
    %33 = arith.truncf %32 : vector<5x8xf32> to vector<5x8xbf16>
    %34 = vector.extract_strided_slice %31 {offsets = [0, 32], sizes = [5, 8], strides = [1, 1]} : vector<5x96xf32> to vector<5x8xf32>
    %35 = arith.truncf %34 : vector<5x8xf32> to vector<5x8xbf16>
    %36 = vector.extract_strided_slice %31 {offsets = [0, 64], sizes = [5, 8], strides = [1, 1]} : vector<5x96xf32> to vector<5x8xf32>
    %37 = arith.truncf %36 : vector<5x8xf32> to vector<5x8xbf16>
    %cst_15 = arith.constant dense<0.000000e+00> : vector<5x5xf32>
    %38 = tpu.matmul %33, %35, %cst_15 {dimension_numbers = #tpu.dot_dimension_numbers<[1], [1], [0], [0], [0, 0, 1, 0], [], []>} : vector<5x8xbf16>, vector<5x8xbf16>, vector<5x5xf32> -> vector<5x5xf32>
    %cst_16 = arith.constant dense<0xFF800000> : vector<5xf32>
    %39 = vector.multi_reduction <maximumf>, %38, %cst_16 [1] : vector<5x5xf32> to vector<5xf32>
    %40 = vector.shape_cast %39 : vector<5xf32> to vector<5x1xf32>
    %41 = vector.broadcast %40 : vector<5x1xf32> to vector<5x5xf32>
    %42 = arith.subf %38, %41 : vector<5x5xf32>
    %43 = math.exp %42 : vector<5x5xf32>
    %cst_17 = arith.constant dense<0.000000e+00> : vector<5xf32>
    %44 = vector.multi_reduction <add>, %43, %cst_17 [1] : vector<5x5xf32> to vector<5xf32>
    %45 = vector.shape_cast %44 : vector<5xf32> to vector<5x1xf32>
    %46 = tpu.reciprocal %45 {approx = true} : vector<5x1xf32> -> vector<5x1xf32>
    %47 = vector.broadcast %46 : vector<5x1xf32> to vector<5x5xf32>
    %48 = arith.mulf %43, %47 : vector<5x5xf32>
    %49 = arith.truncf %48 : vector<5x5xf32> to vector<5x5xbf16>
    %cst_18 = arith.constant dense<0.000000e+00> : vector<5x8xf32>
    %50 = tpu.matmul %49, %37, %cst_18 {dimension_numbers = #tpu.dot_dimension_numbers<[1], [0], [0], [1], [0, 0, 1, 1], [], []>} : vector<5x5xbf16>, vector<5x8xbf16>, vector<5x8xf32> -> vector<5x8xf32>
    %c0_19 = arith.constant 0 : index
    %c0_20 = arith.constant 0 : index
    %51 = vector.load %arg15[%c0_19, %c0_20] : memref<5x32xf32, #tpu.memory_space<vmem>>, vector<5x8xf32>
    tpu.vector_store %arg15[%c0_19, %c0_20], %50 {strides = array<i32>} : memref<5x32xf32, #tpu.memory_space<vmem>>, vector<5x8xf32>,
    %52 = vector.extract_strided_slice %31 {offsets = [0, 8], sizes = [5, 8], strides = [1, 1]} : vector<5x96xf32> to vector<5x8xf32>
    %53 = arith.truncf %52 : vector<5x8xf32> to vector<5x8xbf16>
    %54 = vector.extract_strided_slice %31 {offsets = [0, 40], sizes = [5, 8], strides = [1, 1]} : vector<5x96xf32> to vector<5x8xf32>
    %55 = arith.truncf %54 : vector<5x8xf32> to vector<5x8xbf16>
    %56 = vector.extract_strided_slice %31 {offsets = [0, 72], sizes = [5, 8], strides = [1, 1]} : vector<5x96xf32> to vector<5x8xf32>
    %57 = arith.truncf %56 : vector<5x8xf32> to vector<5x8xbf16>
    %cst_21 = arith.constant dense<0.000000e+00> : vector<5x5xf32>
    %58 = tpu.matmul %53, %55, %cst_21 {dimension_numbers = #tpu.dot_dimension_numbers<[1], [1], [0], [0], [0, 0, 1, 0], [], []>} : vector<5x8xbf16>, vector<5x8xbf16>, vector<5x5xf32> -> vector<5x5xf32>
    %cst_22 = arith.constant dense<0xFF800000> : vector<5xf32>
    %59 = vector.multi_reduction <maximumf>, %58, %cst_22 [1] : vector<5x5xf32> to vector<5xf32>
    %60 = vector.shape_cast %59 : vector<5xf32> to vector<5x1xf32>
    %61 = vector.broadcast %60 : vector<5x1xf32> to vector<5x5xf32>
    %62 = arith.subf %58, %61 : vector<5x5xf32>
    %63 = math.exp %62 : vector<5x5xf32>
    %cst_23 = arith.constant dense<0.000000e+00> : vector<5xf32>
    %64 = vector.multi_reduction <add>, %63, %cst_23 [1] : vector<5x5xf32> to vector<5xf32>
    %65 = vector.shape_cast %64 : vector<5xf32> to vector<5x1xf32>
    %66 = tpu.reciprocal %65 {approx = true} : vector<5x1xf32> -> vector<5x1xf32>
    %67 = vector.broadcast %66 : vector<5x1xf32> to vector<5x5xf32>
    %68 = arith.mulf %63, %67 : vector<5x5xf32>
    %69 = arith.truncf %68 : vector<5x5xf32> to vector<5x5xbf16>
    %cst_24 = arith.constant dense<0.000000e+00> : vector<5x8xf32>
    %70 = tpu.matmul %69, %57, %cst_24 {dimension_numbers = #tpu.dot_dimension_numbers<[1], [0], [0], [1], [0, 0, 1, 1], [], []>} : vector<5x5xbf16>, vector<5x8xbf16>, vector<5x8xf32> -> vector<5x8xf32>
    %c0_25 = arith.constant 0 : index
    %c8 = arith.constant 8 : index
    %71 = vector.load %arg15[%c0_25, %c8] : memref<5x32xf32, #tpu.memory_space<vmem>>, vector<5x8xf32>
    tpu.vector_store %arg15[%c0_25, %c8], %70 {strides = array<i32>} : memref<5x32xf32, #tpu.memory_space<vmem>>, vector<5x8xf32>,
    %72 = vector.extract_strided_slice %31 {offsets = [0, 16], sizes = [5, 8], strides = [1, 1]} : vector<5x96xf32> to vector<5x8xf32>
    %73 = arith.truncf %72 : vector<5x8xf32> to vector<5x8xbf16>
    %74 = vector.extract_strided_slice %31 {offsets = [0, 48], sizes = [5, 8], strides = [1, 1]} : vector<5x96xf32> to vector<5x8xf32>
    %75 = arith.truncf %74 : vector<5x8xf32> to vector<5x8xbf16>
    %76 = vector.extract_strided_slice %31 {offsets = [0, 80], sizes = [5, 8], strides = [1, 1]} : vector<5x96xf32> to vector<5x8xf32>
    %77 = arith.truncf %76 : vector<5x8xf32> to vector<5x8xbf16>
    %cst_26 = arith.constant dense<0.000000e+00> : vector<5x5xf32>
    %78 = tpu.matmul %73, %75, %cst_26 {dimension_numbers = #tpu.dot_dimension_numbers<[1], [1], [0], [0], [0, 0, 1, 0], [], []>} : vector<5x8xbf16>, vector<5x8xbf16>, vector<5x5xf32> -> vector<5x5xf32>
    %cst_27 = arith.constant dense<0xFF800000> : vector<5xf32>
    %79 = vector.multi_reduction <maximumf>, %78, %cst_27 [1] : vector<5x5xf32> to vector<5xf32>
    %80 = vector.shape_cast %79 : vector<5xf32> to vector<5x1xf32>
    %81 = vector.broadcast %80 : vector<5x1xf32> to vector<5x5xf32>
    %82 = arith.subf %78, %81 : vector<5x5xf32>
    %83 = math.exp %82 : vector<5x5xf32>
    %cst_28 = arith.constant dense<0.000000e+00> : vector<5xf32>
    %84 = vector.multi_reduction <add>, %83, %cst_28 [1] : vector<5x5xf32> to vector<5xf32>
    %85 = vector.shape_cast %84 : vector<5xf32> to vector<5x1xf32>
    %86 = tpu.reciprocal %85 {approx = true} : vector<5x1xf32> -> vector<5x1xf32>
    %87 = vector.broadcast %86 : vector<5x1xf32> to vector<5x5xf32>
    %88 = arith.mulf %83, %87 : vector<5x5xf32>
    %89 = arith.truncf %88 : vector<5x5xf32> to vector<5x5xbf16>
    %cst_29 = arith.constant dense<0.000000e+00> : vector<5x8xf32>
    %90 = tpu.matmul %89, %77, %cst_29 {dimension_numbers = #tpu.dot_dimension_numbers<[1], [0], [0], [1], [0, 0, 1, 1], [], []>} : vector<5x5xbf16>, vector<5x8xbf16>, vector<5x8xf32> -> vector<5x8xf32>
    %c0_30 = arith.constant 0 : index
    %c16 = arith.constant 16 : index
    %91 = vector.load %arg15[%c0_30, %c16] : memref<5x32xf32, #tpu.memory_space<vmem>>, vector<5x8xf32>
    tpu.vector_store %arg15[%c0_30, %c16], %90 {strides = array<i32>} : memref<5x32xf32, #tpu.memory_space<vmem>>, vector<5x8xf32>,
    %92 = vector.extract_strided_slice %31 {offsets = [0, 24], sizes = [5, 8], strides = [1, 1]} : vector<5x96xf32> to vector<5x8xf32>
    %93 = arith.truncf %92 : vector<5x8xf32> to vector<5x8xbf16>
    %94 = vector.extract_strided_slice %31 {offsets = [0, 56], sizes = [5, 8], strides = [1, 1]} : vector<5x96xf32> to vector<5x8xf32>
    %95 = arith.truncf %94 : vector<5x8xf32> to vector<5x8xbf16>
    %96 = vector.extract_strided_slice %31 {offsets = [0, 88], sizes = [5, 8], strides = [1, 1]} : vector<5x96xf32> to vector<5x8xf32>
    %97 = arith.truncf %96 : vector<5x8xf32> to vector<5x8xbf16>
    %cst_31 = arith.constant dense<0.000000e+00> : vector<5x5xf32>
    %98 = tpu.matmul %93, %95, %cst_31 {dimension_numbers = #tpu.dot_dimension_numbers<[1], [1], [0], [0], [0, 0, 1, 0], [], []>} : vector<5x8xbf16>, vector<5x8xbf16>, vector<5x5xf32> -> vector<5x5xf32>
    %cst_32 = arith.constant dense<0xFF800000> : vector<5xf32>
    %99 = vector.multi_reduction <maximumf>, %98, %cst_32 [1] : vector<5x5xf32> to vector<5xf32>
    %100 = vector.shape_cast %99 : vector<5xf32> to vector<5x1xf32>
    %101 = vector.broadcast %100 : vector<5x1xf32> to vector<5x5xf32>
    %102 = arith.subf %98, %101 : vector<5x5xf32>
    %103 = math.exp %102 : vector<5x5xf32>
    %cst_33 = arith.constant dense<0.000000e+00> : vector<5xf32>
    %104 = vector.multi_reduction <add>, %103, %cst_33 [1] : vector<5x5xf32> to vector<5xf32>
    %105 = vector.shape_cast %104 : vector<5xf32> to vector<5x1xf32>
    %106 = tpu.reciprocal %105 {approx = true} : vector<5x1xf32> -> vector<5x1xf32>
    %107 = vector.broadcast %106 : vector<5x1xf32> to vector<5x5xf32>
    %108 = arith.mulf %103, %107 : vector<5x5xf32>
    %109 = arith.truncf %108 : vector<5x5xf32> to vector<5x5xbf16>
    %cst_34 = arith.constant dense<0.000000e+00> : vector<5x8xf32>
    %110 = tpu.matmul %109, %97, %cst_34 {dimension_numbers = #tpu.dot_dimension_numbers<[1], [0], [0], [1], [0, 0, 1, 1], [], []>} : vector<5x5xbf16>, vector<5x8xbf16>, vector<5x8xf32> -> vector<5x8xf32>
    %c0_35 = arith.constant 0 : index
    %c24 = arith.constant 24 : index
    %111 = vector.load %arg15[%c0_35, %c24] : memref<5x32xf32, #tpu.memory_space<vmem>>, vector<5x8xf32>
    tpu.vector_store %arg15[%c0_35, %c24], %110 {strides = array<i32>} : memref<5x32xf32, #tpu.memory_space<vmem>>, vector<5x8xf32>,
    %c0_36 = arith.constant 0 : index
    %c0_37 = arith.constant 0 : index
    %112 = vector.load %arg15[%c0_36, %c0_37] : memref<5x32xf32, #tpu.memory_space<vmem>>, vector<5x32xf32>
    %113 = arith.truncf %112 : vector<5x32xf32> to vector<5x32xbf16>
    %c0_38 = arith.constant 0 : index
    %c0_39 = arith.constant 0 : index
    %114 = vector.load %arg6[%c0_38, %c0_39] : memref<32x32xbf16, #tpu.memory_space<vmem>>, vector<32x32xbf16>
    %cst_40 = arith.constant dense<0.000000e+00> : vector<5x32xf32>
    %115 = tpu.matmul %113, %114, %cst_40 {dimension_numbers = #tpu.dot_dimension_numbers<[1], [0], [0], [1], [0, 0, 1, 1], [], []>} : vector<5x32xbf16>, vector<32x32xbf16>, vector<5x32xf32> -> vector<5x32xf32>
    %c0_41 = arith.constant 0 : index
    %c0_42 = arith.constant 0 : index
    %116 = vector.load %arg7[%c0_41, %c0_42] : memref<1x32xf32, #tpu.memory_space<vmem>>, vector<1x32xf32>
    %117 = vector.broadcast %116 : vector<1x32xf32> to vector<5x32xf32>
    %118 = arith.addf %115, %117 : vector<5x32xf32>
    %119 = arith.addf %1, %118 : vector<5x32xf32>
    %c0_43 = arith.constant 0 : index
    %c0_44 = arith.constant 0 : index
    %120 = vector.load %arg8[%c0_43, %c0_44] : memref<1x32xf32, #tpu.memory_space<vmem>>, vector<1x32xf32>
    %c0_45 = arith.constant 0 : index
    %c0_46 = arith.constant 0 : index
    %121 = vector.load %arg9[%c0_45, %c0_46] : memref<1x32xf32, #tpu.memory_space<vmem>>, vector<1x32xf32>
    %cst_47 = arith.constant dense<0.000000e+00> : vector<5xf32>
    %122 = vector.multi_reduction <add>, %119, %cst_47 [1] : vector<5x32xf32> to vector<5xf32>
    %123 = vector.shape_cast %122 : vector<5xf32> to vector<5x1xf32>
    %cst_48 = arith.constant 3.200000e+01 : f32
    %124 = vector.broadcast %cst_48 : f32 to vector<5x1xf32>
    %125 = arith.divf %123, %124 : vector<5x1xf32>
    %126 = vector.broadcast %125 : vector<5x1xf32> to vector<5x32xf32>
    %127 = arith.subf %119, %126 : vector<5x32xf32>
    %128 = arith.mulf %127, %127 : vector<5x32xf32>
    %cst_49 = arith.constant dense<0.000000e+00> : vector<5xf32>
    %129 = vector.multi_reduction <add>, %128, %cst_49 [1] : vector<5x32xf32> to vector<5xf32>
    %130 = vector.shape_cast %129 : vector<5xf32> to vector<5x1xf32>
    %cst_50 = arith.constant 3.200000e+01 : f32
    %131 = vector.broadcast %cst_50 : f32 to vector<5x1xf32>
    %132 = arith.divf %130, %131 : vector<5x1xf32>
    %133 = vector.broadcast %125 : vector<5x1xf32> to vector<5x32xf32>
    %134 = arith.subf %119, %133 : vector<5x32xf32>
    %cst_51 = arith.constant 9.99999974E-6 : f32
    %135 = vector.broadcast %cst_51 : f32 to vector<5x1xf32>
    %136 = arith.addf %132, %135 : vector<5x1xf32>
    %137 = math.rsqrt %136 : vector<5x1xf32>
    %138 = vector.broadcast %137 : vector<5x1xf32> to vector<5x32xf32>
    %139 = arith.mulf %134, %138 : vector<5x32xf32>
    %140 = vector.broadcast %120 : vector<1x32xf32> to vector<5x32xf32>
    %141 = arith.mulf %139, %140 : vector<5x32xf32>
    %142 = vector.broadcast %121 : vector<1x32xf32> to vector<5x32xf32>
    %143 = arith.addf %141, %142 : vector<5x32xf32>
    %144 = arith.truncf %143 : vector<5x32xf32> to vector<5x32xbf16>
    %c0_52 = arith.constant 0 : index
    %c0_53 = arith.constant 0 : index
    %145 = vector.load %arg10[%c0_52, %c0_53] : memref<32x64xbf16, #tpu.memory_space<vmem>>, vector<32x64xbf16>
    %cst_54 = arith.constant dense<0.000000e+00> : vector<5x64xf32>
    %146 = tpu.matmul %144, %145, %cst_54 {dimension_numbers = #tpu.dot_dimension_numbers<[1], [0], [0], [1], [0, 0, 1, 1], [], []>} : vector<5x32xbf16>, vector<32x64xbf16>, vector<5x64xf32> -> vector<5x64xf32>
    %c0_55 = arith.constant 0 : index
    %c0_56 = arith.constant 0 : index
    %147 = vector.load %arg11[%c0_55, %c0_56] : memref<1x64xf32, #tpu.memory_space<vmem>>, vector<1x64xf32>
    %148 = vector.broadcast %147 : vector<1x64xf32> to vector<5x64xf32>
    %149 = arith.addf %146, %148 : vector<5x64xf32>
    %cst_57 = arith.constant 1.702000e+00 : f32
    %150 = vector.broadcast %cst_57 : f32 to vector<5x64xf32>
    %151 = arith.mulf %150, %149 : vector<5x64xf32>
    %152 = arith.negf %151 : vector<5x64xf32>
    %153 = math.exp %152 : vector<5x64xf32>
    %cst_58 = arith.constant 1.000000e+00 : f32
    %154 = vector.broadcast %cst_58 : f32 to vector<5x64xf32>
    %155 = arith.addf %154, %153 : vector<5x64xf32>
    %156 = arith.divf %154, %155 : vector<5x64xf32>
    %157 = arith.mulf %149, %156 : vector<5x64xf32>
    %158 = arith.truncf %157 : vector<5x64xf32> to vector<5x64xbf16>
    %c0_59 = arith.constant 0 : index
    %c0_60 = arith.constant 0 : index
    %159 = vector.load %arg12[%c0_59, %c0_60] : memref<64x32xbf16, #tpu.memory_space<vmem>>, vector<64x32xbf16>
    %cst_61 = arith.constant dense<0.000000e+00> : vector<5x32xf32>
    %160 = tpu.matmul %158, %159, %cst_61 {dimension_numbers = #tpu.dot_dimension_numbers<[1], [0], [0], [1], [0, 0, 1, 1], [], []>} : vector<5x64xbf16>, vector<64x32xbf16>, vector<5x32xf32> -> vector<5x32xf32>
    %c0_62 = arith.constant 0 : index
    %c0_63 = arith.constant 0 : index
    %161 = vector.load %arg13[%c0_62, %c0_63] : memref<1x32xf32, #tpu.memory_space<vmem>>, vector<1x32xf32>
    %162 = vector.broadcast %161 : vector<1x32xf32> to vector<5x32xf32>
    %163 = arith.addf %160, %162 : vector<5x32xf32>
    %164 = arith.addf %119, %163 : vector<5x32xf32>
    %c0_64 = arith.constant 0 : index
    %c0_65 = arith.constant 0 : index
    %c0_66 = arith.constant 0 : index
    %165 = vector.load %arg14[%c0_64, %c0_65, %c0_66] : memref<1x5x32xf32, #tpu.memory_space<vmem>>, vector<1x5x32xf32>
    %166 = vector.shape_cast %165 : vector<1x5x32xf32> to vector<5x32xf32>
    %167 = vector.shape_cast %164 : vector<5x32xf32> to vector<1x5x32xf32>
    tpu.vector_store %arg14[%c0_64, %c0_65, %c0_66], %167 {strides = array<i32>} : memref<1x5x32xf32, #tpu.memory_space<vmem>>, vector<1x5x32xf32>,
    return
  }
  func.func @transform_0(%arg0: i32) -> (i32, i32, i32) {
    %c0_i32 = arith.constant 0 : i32
    %c0_i32_0 = arith.constant 0 : i32
    %c0_i32_1 = arith.constant 0 : i32
    return %arg0, %c0_i32, %c0_i32_0 : i32, i32, i32
  }
  func.func @transform_1(%arg0: i32) -> (i32, i32) {
    %c0_i32 = arith.constant 0 : i32
    %c0_i32_0 = arith.constant 0 : i32
    %c0_i32_1 = arith.constant 0 : i32
    return %c0_i32, %c0_i32_0 : i32, i32
  }
  func.func @transform_2(%arg0: i32) -> (i32, i32) {
    %c0_i32 = arith.constant 0 : i32
    %c0_i32_0 = arith.constant 0 : i32
    %c0_i32_1 = arith.constant 0 : i32
    return %c0_i32, %c0_i32_0 : i32, i32
  }
  func.func @transform_3(%arg0: i32) -> (i32, i32) {
    %c0_i32 = arith.constant 0 : i32
    %c0_i32_0 = arith.constant 0 : i32
    %c0_i32_1 = arith.constant 0 : i32
    return %c0_i32, %c0_i32_0 : i32, i32
  }
  func.func @transform_4(%arg0: i32) -> (i32, i32) {
    %c0_i32 = arith.constant 0 : i32
    %c0_i32_0 = arith.constant 0 : i32
    %c0_i32_1 = arith.constant 0 : i32
    return %c0_i32, %c0_i32_0 : i32, i32
  }
  func.func @transform_5(%arg0: i32) -> (i32, i32) {
    %c0_i32 = arith.constant 0 : i32
    %c0_i32_0 = arith.constant 0 : i32
    %c0_i32_1 = arith.constant 0 : i32
    return %c0_i32, %c0_i32_0 : i32, i32
  }
  func.func @transform_6(%arg0: i32) -> (i32, i32) {
    %c0_i32 = arith.constant 0 : i32
    %c0_i32_0 = arith.constant 0 : i32
    %c0_i32_1 = arith.constant 0 : i32
    return %c0_i32, %c0_i32_0 : i32, i32
  }
  func.func @transform_7(%arg0: i32) -> (i32, i32) {
    %c0_i32 = arith.constant 0 : i32
    %c0_i32_0 = arith.constant 0 : i32
    %c0_i32_1 = arith.constant 0 : i32
    return %c0_i32, %c0_i32_0 : i32, i32
  }
  func.func @transform_8(%arg0: i32) -> (i32, i32) {
    %c0_i32 = arith.constant 0 : i32
    %c0_i32_0 = arith.constant 0 : i32
    %c0_i32_1 = arith.constant 0 : i32
    return %c0_i32, %c0_i32_0 : i32, i32
  }
  func.func @transform_9(%arg0: i32) -> (i32, i32) {
    %c0_i32 = arith.constant 0 : i32
    %c0_i32_0 = arith.constant 0 : i32
    %c0_i32_1 = arith.constant 0 : i32
    return %c0_i32, %c0_i32_0 : i32, i32
  }
  func.func @transform_10(%arg0: i32) -> (i32, i32) {
    %c0_i32 = arith.constant 0 : i32
    %c0_i32_0 = arith.constant 0 : i32
    %c0_i32_1 = arith.constant 0 : i32
    return %c0_i32, %c0_i32_0 : i32, i32
  }
  func.func @transform_11(%arg0: i32) -> (i32, i32) {
    %c0_i32 = arith.constant 0 : i32
    %c0_i32_0 = arith.constant 0 : i32
    %c0_i32_1 = arith.constant 0 : i32
    return %c0_i32, %c0_i32_0 : i32, i32
  }
  func.func @transform_12(%arg0: i32) -> (i32, i32) {
    %c0_i32 = arith.constant 0 : i32
    %c0_i32_0 = arith.constant 0 : i32
    %c0_i32_1 = arith.constant 0 : i32
    return %c0_i32, %c0_i32_0 : i32, i32
  }
  func.func @transform_13(%arg0: i32) -> (i32, i32, i32) {
    %c0_i32 = arith.constant 0 : i32
    %c0_i32_0 = arith.constant 0 : i32
    %c0_i32_1 = arith.constant 0 : i32
    return %arg0, %c0_i32, %c0_i32_0 : i32, i32, i32
  }
}

module attributes {stable_mosaic.version = 11 : i64} {
  func.func @_ln_proj_l2norm_kernel(%arg0: i32, %arg1: memref<2x32xf32, #tpu.memory_space<vmem>>, %arg2: memref<1x32xf32, #tpu.memory_space<vmem>>, %arg3: memref<1x32xf32, #tpu.memory_space<vmem>>, %arg4: memref<32x32xbf16, #tpu.memory_space<vmem>>, %arg5: memref<2x32xf32, #tpu.memory_space<vmem>>) attributes {dimension_semantics = [#tpu.dimension_semantics<arbitrary>], iteration_bounds = array<i64: 1>, scalar_prefetch = 0 : i64, scratch_operands = 0 : i64, tpu.core_type = #tpu.core_type<tc>, window_params = [{pipeline_mode = #tpu.pipeline_mode<synchronous>, transform_indices = @transform_0, window_bounds = array<i64: 2, 32>}, {pipeline_mode = #tpu.pipeline_mode<synchronous>, transform_indices = @transform_1, window_bounds = array<i64: 1, 32>}, {pipeline_mode = #tpu.pipeline_mode<synchronous>, transform_indices = @transform_2, window_bounds = array<i64: 1, 32>}, {pipeline_mode = #tpu.pipeline_mode<synchronous>, transform_indices = @transform_3, window_bounds = array<i64: 32, 32>}, {pipeline_mode = #tpu.pipeline_mode<synchronous>, transform_indices = @transform_4, window_bounds = array<i64: 2, 32>}]} {
    %c0 = arith.constant 0 : index
    %c0_0 = arith.constant 0 : index
    %0 = vector.load %arg1[%c0, %c0_0] : memref<2x32xf32, #tpu.memory_space<vmem>>, vector<2x32xf32>
    %c0_1 = arith.constant 0 : index
    %c0_2 = arith.constant 0 : index
    %1 = vector.load %arg2[%c0_1, %c0_2] : memref<1x32xf32, #tpu.memory_space<vmem>>, vector<1x32xf32>
    %c0_3 = arith.constant 0 : index
    %c0_4 = arith.constant 0 : index
    %2 = vector.load %arg3[%c0_3, %c0_4] : memref<1x32xf32, #tpu.memory_space<vmem>>, vector<1x32xf32>
    %cst = arith.constant dense<0.000000e+00> : vector<2xf32>
    %3 = vector.multi_reduction <add>, %0, %cst [1] : vector<2x32xf32> to vector<2xf32>
    %4 = vector.shape_cast %3 : vector<2xf32> to vector<2x1xf32>
    %cst_5 = arith.constant 3.200000e+01 : f32
    %5 = vector.broadcast %cst_5 : f32 to vector<2x1xf32>
    %6 = arith.divf %4, %5 : vector<2x1xf32>
    %7 = vector.broadcast %6 : vector<2x1xf32> to vector<2x32xf32>
    %8 = arith.subf %0, %7 : vector<2x32xf32>
    %9 = arith.mulf %8, %8 : vector<2x32xf32>
    %cst_6 = arith.constant dense<0.000000e+00> : vector<2xf32>
    %10 = vector.multi_reduction <add>, %9, %cst_6 [1] : vector<2x32xf32> to vector<2xf32>
    %11 = vector.shape_cast %10 : vector<2xf32> to vector<2x1xf32>
    %cst_7 = arith.constant 3.200000e+01 : f32
    %12 = vector.broadcast %cst_7 : f32 to vector<2x1xf32>
    %13 = arith.divf %11, %12 : vector<2x1xf32>
    %14 = vector.broadcast %6 : vector<2x1xf32> to vector<2x32xf32>
    %15 = arith.subf %0, %14 : vector<2x32xf32>
    %cst_8 = arith.constant 9.99999974E-6 : f32
    %16 = vector.broadcast %cst_8 : f32 to vector<2x1xf32>
    %17 = arith.addf %13, %16 : vector<2x1xf32>
    %18 = math.rsqrt %17 : vector<2x1xf32>
    %19 = vector.broadcast %18 : vector<2x1xf32> to vector<2x32xf32>
    %20 = arith.mulf %15, %19 : vector<2x32xf32>
    %21 = vector.broadcast %1 : vector<1x32xf32> to vector<2x32xf32>
    %22 = arith.mulf %20, %21 : vector<2x32xf32>
    %23 = vector.broadcast %2 : vector<1x32xf32> to vector<2x32xf32>
    %24 = arith.addf %22, %23 : vector<2x32xf32>
    %25 = arith.truncf %24 : vector<2x32xf32> to vector<2x32xbf16>
    %c0_9 = arith.constant 0 : index
    %c0_10 = arith.constant 0 : index
    %26 = vector.load %arg4[%c0_9, %c0_10] : memref<32x32xbf16, #tpu.memory_space<vmem>>, vector<32x32xbf16>
    %cst_11 = arith.constant dense<0.000000e+00> : vector<2x32xf32>
    %27 = tpu.matmul %25, %26, %cst_11 {dimension_numbers = #tpu.dot_dimension_numbers<[1], [0], [0], [1], [0, 0, 1, 1], [], []>} : vector<2x32xbf16>, vector<32x32xbf16>, vector<2x32xf32> -> vector<2x32xf32>
    %28 = arith.mulf %27, %27 : vector<2x32xf32>
    %cst_12 = arith.constant dense<0.000000e+00> : vector<2xf32>
    %29 = vector.multi_reduction <add>, %28, %cst_12 [1] : vector<2x32xf32> to vector<2xf32>
    %30 = vector.shape_cast %29 : vector<2xf32> to vector<2x1xf32>
    %31 = math.rsqrt %30 : vector<2x1xf32>
    %32 = vector.broadcast %31 : vector<2x1xf32> to vector<2x32xf32>
    %33 = arith.mulf %27, %32 : vector<2x32xf32>
    %c0_13 = arith.constant 0 : index
    %c0_14 = arith.constant 0 : index
    %34 = vector.load %arg5[%c0_13, %c0_14] : memref<2x32xf32, #tpu.memory_space<vmem>>, vector<2x32xf32>
    tpu.vector_store %arg5[%c0_13, %c0_14], %33 {strides = array<i32>} : memref<2x32xf32, #tpu.memory_space<vmem>>, vector<2x32xf32>,
    return
  }
  func.func @transform_0(%arg0: i32) -> (i32, i32) {
    %c0_i32 = arith.constant 0 : i32
    %c0_i32_0 = arith.constant 0 : i32
    %c0_i32_1 = arith.constant 0 : i32
    return %c0_i32, %c0_i32_0 : i32, i32
  }
  func.func @transform_1(%arg0: i32) -> (i32, i32) {
    %c0_i32 = arith.constant 0 : i32
    %c0_i32_0 = arith.constant 0 : i32
    %c0_i32_1 = arith.constant 0 : i32
    return %c0_i32, %c0_i32_0 : i32, i32
  }
  func.func @transform_2(%arg0: i32) -> (i32, i32) {
    %c0_i32 = arith.constant 0 : i32
    %c0_i32_0 = arith.constant 0 : i32
    %c0_i32_1 = arith.constant 0 : i32
    return %c0_i32, %c0_i32_0 : i32, i32
  }
  func.func @transform_3(%arg0: i32) -> (i32, i32) {
    %c0_i32 = arith.constant 0 : i32
    %c0_i32_0 = arith.constant 0 : i32
    %c0_i32_1 = arith.constant 0 : i32
    return %c0_i32, %c0_i32_0 : i32, i32
  }
  func.func @transform_4(%arg0: i32) -> (i32, i32) {
    %c0_i32 = arith.constant 0 : i32
    %c0_i32_0 = arith.constant 0 : i32
    %c0_i32_1 = arith.constant 0 : i32
    return %c0_i32, %c0_i32_0 : i32, i32
  }
}

module attributes {stable_mosaic.version = 11 : i64} {
  func.func @_clip_layer_kernel(%arg0: i32, %arg1: memref<1x8x32xf32, #tpu.memory_space<vmem>>, %arg2: memref<1x1x8xf32, #tpu.memory_space<vmem>>, %arg3: memref<1x32xf32, #tpu.memory_space<vmem>>, %arg4: memref<1x32xf32, #tpu.memory_space<vmem>>, %arg5: memref<32x96xbf16, #tpu.memory_space<vmem>>, %arg6: memref<1x96xf32, #tpu.memory_space<vmem>>, %arg7: memref<32x32xbf16, #tpu.memory_space<vmem>>, %arg8: memref<1x32xf32, #tpu.memory_space<vmem>>, %arg9: memref<1x32xf32, #tpu.memory_space<vmem>>, %arg10: memref<1x32xf32, #tpu.memory_space<vmem>>, %arg11: memref<32x64xbf16, #tpu.memory_space<vmem>>, %arg12: memref<1x64xf32, #tpu.memory_space<vmem>>, %arg13: memref<64x32xbf16, #tpu.memory_space<vmem>>, %arg14: memref<1x32xf32, #tpu.memory_space<vmem>>, %arg15: memref<1x8x32xf32, #tpu.memory_space<vmem>>, %arg16: memref<8x32xf32, #tpu.memory_space<vmem>>) attributes {dimension_semantics = [#tpu.dimension_semantics<parallel>], iteration_bounds = array<i64: 2>, scalar_prefetch = 0 : i64, scratch_operands = 1 : i64, tpu.core_type = #tpu.core_type<tc>, window_params = [{transform_indices = @transform_0, window_bounds = array<i64: 1, 8, 32>}, {transform_indices = @transform_1, window_bounds = array<i64: 1, 1, 8>}, {pipeline_mode = #tpu.pipeline_mode<synchronous>, transform_indices = @transform_2, window_bounds = array<i64: 1, 32>}, {pipeline_mode = #tpu.pipeline_mode<synchronous>, transform_indices = @transform_3, window_bounds = array<i64: 1, 32>}, {pipeline_mode = #tpu.pipeline_mode<synchronous>, transform_indices = @transform_4, window_bounds = array<i64: 32, 96>}, {pipeline_mode = #tpu.pipeline_mode<synchronous>, transform_indices = @transform_5, window_bounds = array<i64: 1, 96>}, {pipeline_mode = #tpu.pipeline_mode<synchronous>, transform_indices = @transform_6, window_bounds = array<i64: 32, 32>}, {pipeline_mode = #tpu.pipeline_mode<synchronous>, transform_indices = @transform_7, window_bounds = array<i64: 1, 32>}, {pipeline_mode = #tpu.pipeline_mode<synchronous>, transform_indices = @transform_8, window_bounds = array<i64: 1, 32>}, {pipeline_mode = #tpu.pipeline_mode<synchronous>, transform_indices = @transform_9, window_bounds = array<i64: 1, 32>}, {pipeline_mode = #tpu.pipeline_mode<synchronous>, transform_indices = @transform_10, window_bounds = array<i64: 32, 64>}, {pipeline_mode = #tpu.pipeline_mode<synchronous>, transform_indices = @transform_11, window_bounds = array<i64: 1, 64>}, {pipeline_mode = #tpu.pipeline_mode<synchronous>, transform_indices = @transform_12, window_bounds = array<i64: 64, 32>}, {pipeline_mode = #tpu.pipeline_mode<synchronous>, transform_indices = @transform_13, window_bounds = array<i64: 1, 32>}, {transform_indices = @transform_14, window_bounds = array<i64: 1, 8, 32>}]} {
    %c0 = arith.constant 0 : index
    %c0_0 = arith.constant 0 : index
    %c0_1 = arith.constant 0 : index
    %0 = vector.load %arg1[%c0, %c0_0, %c0_1] : memref<1x8x32xf32, #tpu.memory_space<vmem>>, vector<1x8x32xf32>
    %1 = vector.shape_cast %0 : vector<1x8x32xf32> to vector<8x32xf32>
    %c0_2 = arith.constant 0 : index
    %c0_3 = arith.constant 0 : index
    %2 = vector.load %arg3[%c0_2, %c0_3] : memref<1x32xf32, #tpu.memory_space<vmem>>, vector<1x32xf32>
    %c0_4 = arith.constant 0 : index
    %c0_5 = arith.constant 0 : index
    %3 = vector.load %arg4[%c0_4, %c0_5] : memref<1x32xf32, #tpu.memory_space<vmem>>, vector<1x32xf32>
    %cst = arith.constant dense<0.000000e+00> : vector<8xf32>
    %4 = vector.multi_reduction <add>, %1, %cst [1] : vector<8x32xf32> to vector<8xf32>
    %5 = vector.shape_cast %4 : vector<8xf32> to vector<8x1xf32>
    %cst_6 = arith.constant 3.200000e+01 : f32
    %6 = vector.broadcast %cst_6 : f32 to vector<8x1xf32>
    %7 = arith.divf %5, %6 : vector<8x1xf32>
    %8 = vector.broadcast %7 : vector<8x1xf32> to vector<8x32xf32>
    %9 = arith.subf %1, %8 : vector<8x32xf32>
    %10 = arith.mulf %9, %9 : vector<8x32xf32>
    %cst_7 = arith.constant dense<0.000000e+00> : vector<8xf32>
    %11 = vector.multi_reduction <add>, %10, %cst_7 [1] : vector<8x32xf32> to vector<8xf32>
    %12 = vector.shape_cast %11 : vector<8xf32> to vector<8x1xf32>
    %cst_8 = arith.constant 3.200000e+01 : f32
    %13 = vector.broadcast %cst_8 : f32 to vector<8x1xf32>
    %14 = arith.divf %12, %13 : vector<8x1xf32>
    %15 = vector.broadcast %7 : vector<8x1xf32> to vector<8x32xf32>
    %16 = arith.subf %1, %15 : vector<8x32xf32>
    %cst_9 = arith.constant 9.99999974E-6 : f32
    %17 = vector.broadcast %cst_9 : f32 to vector<8x1xf32>
    %18 = arith.addf %14, %17 : vector<8x1xf32>
    %19 = math.rsqrt %18 : vector<8x1xf32>
    %20 = vector.broadcast %19 : vector<8x1xf32> to vector<8x32xf32>
    %21 = arith.mulf %16, %20 : vector<8x32xf32>
    %22 = vector.broadcast %2 : vector<1x32xf32> to vector<8x32xf32>
    %23 = arith.mulf %21, %22 : vector<8x32xf32>
    %24 = vector.broadcast %3 : vector<1x32xf32> to vector<8x32xf32>
    %25 = arith.addf %23, %24 : vector<8x32xf32>
    %26 = arith.truncf %25 : vector<8x32xf32> to vector<8x32xbf16>
    %c0_10 = arith.constant 0 : index
    %c0_11 = arith.constant 0 : index
    %27 = vector.load %arg5[%c0_10, %c0_11] : memref<32x96xbf16, #tpu.memory_space<vmem>>, vector<32x96xbf16>
    %cst_12 = arith.constant dense<0.000000e+00> : vector<8x96xf32>
    %28 = tpu.matmul %26, %27, %cst_12 {dimension_numbers = #tpu.dot_dimension_numbers<[1], [0], [0], [1], [0, 0, 1, 1], [], []>} : vector<8x32xbf16>, vector<32x96xbf16>, vector<8x96xf32> -> vector<8x96xf32>
    %c0_13 = arith.constant 0 : index
    %c0_14 = arith.constant 0 : index
    %29 = vector.load %arg6[%c0_13, %c0_14] : memref<1x96xf32, #tpu.memory_space<vmem>>, vector<1x96xf32>
    %30 = vector.broadcast %29 : vector<1x96xf32> to vector<8x96xf32>
    %31 = arith.addf %28, %30 : vector<8x96xf32>
    %c0_15 = arith.constant 0 : index
    %c0_16 = arith.constant 0 : index
    %c0_17 = arith.constant 0 : index
    %32 = vector.load %arg2[%c0_15, %c0_16, %c0_17] : memref<1x1x8xf32, #tpu.memory_space<vmem>>, vector<1x1x8xf32>
    %33 = vector.shape_cast %32 : vector<1x1x8xf32> to vector<1x8xf32>
    %34 = tpu.iota {dimensions = array<i32: 0>} : vector<8x8xi32>
    %35 = tpu.iota {dimensions = array<i32: 1>} : vector<8x8xi32>
    %36 = arith.cmpi sle, %35, %34 : vector<8x8xi32>
    %cst_18 = arith.constant 0.000000e+00 : f32
    %cst_19 = arith.constant -1.000000e+09 : f32
    %37 = vector.broadcast %cst_18 : f32 to vector<8x8xf32>
    %38 = vector.broadcast %cst_19 : f32 to vector<8x8xf32>
    %39 = arith.select %36, %37, %38 : vector<8x8xi1>, vector<8x8xf32>
    %cst_20 = arith.constant 1.000000e+00 : f32
    %40 = vector.broadcast %cst_20 : f32 to vector<1x8xf32>
    %41 = arith.subf %40, %33 : vector<1x8xf32>
    %cst_21 = arith.constant -1.000000e+09 : f32
    %42 = vector.broadcast %cst_21 : f32 to vector<1x8xf32>
    %43 = arith.mulf %41, %42 : vector<1x8xf32>
    %44 = vector.broadcast %43 : vector<1x8xf32> to vector<8x8xf32>
    %45 = arith.addf %39, %44 : vector<8x8xf32>
    %46 = vector.extract_strided_slice %31 {offsets = [0, 0], sizes = [8, 8], strides = [1, 1]} : vector<8x96xf32> to vector<8x8xf32>
    %47 = arith.truncf %46 : vector<8x8xf32> to vector<8x8xbf16>
    %48 = vector.extract_strided_slice %31 {offsets = [0, 32], sizes = [8, 8], strides = [1, 1]} : vector<8x96xf32> to vector<8x8xf32>
    %49 = arith.truncf %48 : vector<8x8xf32> to vector<8x8xbf16>
    %50 = vector.extract_strided_slice %31 {offsets = [0, 64], sizes = [8, 8], strides = [1, 1]} : vector<8x96xf32> to vector<8x8xf32>
    %51 = arith.truncf %50 : vector<8x8xf32> to vector<8x8xbf16>
    %cst_22 = arith.constant dense<0.000000e+00> : vector<8x8xf32>
    %52 = tpu.matmul %47, %49, %cst_22 {dimension_numbers = #tpu.dot_dimension_numbers<[1], [1], [0], [0], [0, 0, 1, 0], [], []>} : vector<8x8xbf16>, vector<8x8xbf16>, vector<8x8xf32> -> vector<8x8xf32>
    %53 = arith.addf %52, %45 : vector<8x8xf32>
    %cst_23 = arith.constant dense<0xFF800000> : vector<8xf32>
    %54 = vector.multi_reduction <maximumf>, %53, %cst_23 [1] : vector<8x8xf32> to vector<8xf32>
    %55 = vector.shape_cast %54 : vector<8xf32> to vector<8x1xf32>
    %56 = vector.broadcast %55 : vector<8x1xf32> to vector<8x8xf32>
    %57 = arith.subf %53, %56 : vector<8x8xf32>
    %58 = math.exp %57 : vector<8x8xf32>
    %cst_24 = arith.constant dense<0.000000e+00> : vector<8xf32>
    %59 = vector.multi_reduction <add>, %58, %cst_24 [1] : vector<8x8xf32> to vector<8xf32>
    %60 = vector.shape_cast %59 : vector<8xf32> to vector<8x1xf32>
    %61 = tpu.reciprocal %60 {approx = true} : vector<8x1xf32> -> vector<8x1xf32>
    %62 = vector.broadcast %61 : vector<8x1xf32> to vector<8x8xf32>
    %63 = arith.mulf %58, %62 : vector<8x8xf32>
    %64 = arith.truncf %63 : vector<8x8xf32> to vector<8x8xbf16>
    %cst_25 = arith.constant dense<0.000000e+00> : vector<8x8xf32>
    %65 = tpu.matmul %64, %51, %cst_25 {dimension_numbers = #tpu.dot_dimension_numbers<[1], [0], [0], [1], [0, 0, 1, 1], [], []>} : vector<8x8xbf16>, vector<8x8xbf16>, vector<8x8xf32> -> vector<8x8xf32>
    %c0_26 = arith.constant 0 : index
    %c0_27 = arith.constant 0 : index
    %66 = vector.load %arg16[%c0_26, %c0_27] : memref<8x32xf32, #tpu.memory_space<vmem>>, vector<8x8xf32>
    tpu.vector_store %arg16[%c0_26, %c0_27], %65 {strides = array<i32>} : memref<8x32xf32, #tpu.memory_space<vmem>>, vector<8x8xf32>,
    %67 = vector.extract_strided_slice %31 {offsets = [0, 8], sizes = [8, 8], strides = [1, 1]} : vector<8x96xf32> to vector<8x8xf32>
    %68 = arith.truncf %67 : vector<8x8xf32> to vector<8x8xbf16>
    %69 = vector.extract_strided_slice %31 {offsets = [0, 40], sizes = [8, 8], strides = [1, 1]} : vector<8x96xf32> to vector<8x8xf32>
    %70 = arith.truncf %69 : vector<8x8xf32> to vector<8x8xbf16>
    %71 = vector.extract_strided_slice %31 {offsets = [0, 72], sizes = [8, 8], strides = [1, 1]} : vector<8x96xf32> to vector<8x8xf32>
    %72 = arith.truncf %71 : vector<8x8xf32> to vector<8x8xbf16>
    %cst_28 = arith.constant dense<0.000000e+00> : vector<8x8xf32>
    %73 = tpu.matmul %68, %70, %cst_28 {dimension_numbers = #tpu.dot_dimension_numbers<[1], [1], [0], [0], [0, 0, 1, 0], [], []>} : vector<8x8xbf16>, vector<8x8xbf16>, vector<8x8xf32> -> vector<8x8xf32>
    %74 = arith.addf %73, %45 : vector<8x8xf32>
    %cst_29 = arith.constant dense<0xFF800000> : vector<8xf32>
    %75 = vector.multi_reduction <maximumf>, %74, %cst_29 [1] : vector<8x8xf32> to vector<8xf32>
    %76 = vector.shape_cast %75 : vector<8xf32> to vector<8x1xf32>
    %77 = vector.broadcast %76 : vector<8x1xf32> to vector<8x8xf32>
    %78 = arith.subf %74, %77 : vector<8x8xf32>
    %79 = math.exp %78 : vector<8x8xf32>
    %cst_30 = arith.constant dense<0.000000e+00> : vector<8xf32>
    %80 = vector.multi_reduction <add>, %79, %cst_30 [1] : vector<8x8xf32> to vector<8xf32>
    %81 = vector.shape_cast %80 : vector<8xf32> to vector<8x1xf32>
    %82 = tpu.reciprocal %81 {approx = true} : vector<8x1xf32> -> vector<8x1xf32>
    %83 = vector.broadcast %82 : vector<8x1xf32> to vector<8x8xf32>
    %84 = arith.mulf %79, %83 : vector<8x8xf32>
    %85 = arith.truncf %84 : vector<8x8xf32> to vector<8x8xbf16>
    %cst_31 = arith.constant dense<0.000000e+00> : vector<8x8xf32>
    %86 = tpu.matmul %85, %72, %cst_31 {dimension_numbers = #tpu.dot_dimension_numbers<[1], [0], [0], [1], [0, 0, 1, 1], [], []>} : vector<8x8xbf16>, vector<8x8xbf16>, vector<8x8xf32> -> vector<8x8xf32>
    %c0_32 = arith.constant 0 : index
    %c8 = arith.constant 8 : index
    %87 = vector.load %arg16[%c0_32, %c8] : memref<8x32xf32, #tpu.memory_space<vmem>>, vector<8x8xf32>
    tpu.vector_store %arg16[%c0_32, %c8], %86 {strides = array<i32>} : memref<8x32xf32, #tpu.memory_space<vmem>>, vector<8x8xf32>,
    %88 = vector.extract_strided_slice %31 {offsets = [0, 16], sizes = [8, 8], strides = [1, 1]} : vector<8x96xf32> to vector<8x8xf32>
    %89 = arith.truncf %88 : vector<8x8xf32> to vector<8x8xbf16>
    %90 = vector.extract_strided_slice %31 {offsets = [0, 48], sizes = [8, 8], strides = [1, 1]} : vector<8x96xf32> to vector<8x8xf32>
    %91 = arith.truncf %90 : vector<8x8xf32> to vector<8x8xbf16>
    %92 = vector.extract_strided_slice %31 {offsets = [0, 80], sizes = [8, 8], strides = [1, 1]} : vector<8x96xf32> to vector<8x8xf32>
    %93 = arith.truncf %92 : vector<8x8xf32> to vector<8x8xbf16>
    %cst_33 = arith.constant dense<0.000000e+00> : vector<8x8xf32>
    %94 = tpu.matmul %89, %91, %cst_33 {dimension_numbers = #tpu.dot_dimension_numbers<[1], [1], [0], [0], [0, 0, 1, 0], [], []>} : vector<8x8xbf16>, vector<8x8xbf16>, vector<8x8xf32> -> vector<8x8xf32>
    %95 = arith.addf %94, %45 : vector<8x8xf32>
    %cst_34 = arith.constant dense<0xFF800000> : vector<8xf32>
    %96 = vector.multi_reduction <maximumf>, %95, %cst_34 [1] : vector<8x8xf32> to vector<8xf32>
    %97 = vector.shape_cast %96 : vector<8xf32> to vector<8x1xf32>
    %98 = vector.broadcast %97 : vector<8x1xf32> to vector<8x8xf32>
    %99 = arith.subf %95, %98 : vector<8x8xf32>
    %100 = math.exp %99 : vector<8x8xf32>
    %cst_35 = arith.constant dense<0.000000e+00> : vector<8xf32>
    %101 = vector.multi_reduction <add>, %100, %cst_35 [1] : vector<8x8xf32> to vector<8xf32>
    %102 = vector.shape_cast %101 : vector<8xf32> to vector<8x1xf32>
    %103 = tpu.reciprocal %102 {approx = true} : vector<8x1xf32> -> vector<8x1xf32>
    %104 = vector.broadcast %103 : vector<8x1xf32> to vector<8x8xf32>
    %105 = arith.mulf %100, %104 : vector<8x8xf32>
    %106 = arith.truncf %105 : vector<8x8xf32> to vector<8x8xbf16>
    %cst_36 = arith.constant dense<0.000000e+00> : vector<8x8xf32>
    %107 = tpu.matmul %106, %93, %cst_36 {dimension_numbers = #tpu.dot_dimension_numbers<[1], [0], [0], [1], [0, 0, 1, 1], [], []>} : vector<8x8xbf16>, vector<8x8xbf16>, vector<8x8xf32> -> vector<8x8xf32>
    %c0_37 = arith.constant 0 : index
    %c16 = arith.constant 16 : index
    %108 = vector.load %arg16[%c0_37, %c16] : memref<8x32xf32, #tpu.memory_space<vmem>>, vector<8x8xf32>
    tpu.vector_store %arg16[%c0_37, %c16], %107 {strides = array<i32>} : memref<8x32xf32, #tpu.memory_space<vmem>>, vector<8x8xf32>,
    %109 = vector.extract_strided_slice %31 {offsets = [0, 24], sizes = [8, 8], strides = [1, 1]} : vector<8x96xf32> to vector<8x8xf32>
    %110 = arith.truncf %109 : vector<8x8xf32> to vector<8x8xbf16>
    %111 = vector.extract_strided_slice %31 {offsets = [0, 56], sizes = [8, 8], strides = [1, 1]} : vector<8x96xf32> to vector<8x8xf32>
    %112 = arith.truncf %111 : vector<8x8xf32> to vector<8x8xbf16>
    %113 = vector.extract_strided_slice %31 {offsets = [0, 88], sizes = [8, 8], strides = [1, 1]} : vector<8x96xf32> to vector<8x8xf32>
    %114 = arith.truncf %113 : vector<8x8xf32> to vector<8x8xbf16>
    %cst_38 = arith.constant dense<0.000000e+00> : vector<8x8xf32>
    %115 = tpu.matmul %110, %112, %cst_38 {dimension_numbers = #tpu.dot_dimension_numbers<[1], [1], [0], [0], [0, 0, 1, 0], [], []>} : vector<8x8xbf16>, vector<8x8xbf16>, vector<8x8xf32> -> vector<8x8xf32>
    %116 = arith.addf %115, %45 : vector<8x8xf32>
    %cst_39 = arith.constant dense<0xFF800000> : vector<8xf32>
    %117 = vector.multi_reduction <maximumf>, %116, %cst_39 [1] : vector<8x8xf32> to vector<8xf32>
    %118 = vector.shape_cast %117 : vector<8xf32> to vector<8x1xf32>
    %119 = vector.broadcast %118 : vector<8x1xf32> to vector<8x8xf32>
    %120 = arith.subf %116, %119 : vector<8x8xf32>
    %121 = math.exp %120 : vector<8x8xf32>
    %cst_40 = arith.constant dense<0.000000e+00> : vector<8xf32>
    %122 = vector.multi_reduction <add>, %121, %cst_40 [1] : vector<8x8xf32> to vector<8xf32>
    %123 = vector.shape_cast %122 : vector<8xf32> to vector<8x1xf32>
    %124 = tpu.reciprocal %123 {approx = true} : vector<8x1xf32> -> vector<8x1xf32>
    %125 = vector.broadcast %124 : vector<8x1xf32> to vector<8x8xf32>
    %126 = arith.mulf %121, %125 : vector<8x8xf32>
    %127 = arith.truncf %126 : vector<8x8xf32> to vector<8x8xbf16>
    %cst_41 = arith.constant dense<0.000000e+00> : vector<8x8xf32>
    %128 = tpu.matmul %127, %114, %cst_41 {dimension_numbers = #tpu.dot_dimension_numbers<[1], [0], [0], [1], [0, 0, 1, 1], [], []>} : vector<8x8xbf16>, vector<8x8xbf16>, vector<8x8xf32> -> vector<8x8xf32>
    %c0_42 = arith.constant 0 : index
    %c24 = arith.constant 24 : index
    %129 = vector.load %arg16[%c0_42, %c24] : memref<8x32xf32, #tpu.memory_space<vmem>>, vector<8x8xf32>
    tpu.vector_store %arg16[%c0_42, %c24], %128 {strides = array<i32>} : memref<8x32xf32, #tpu.memory_space<vmem>>, vector<8x8xf32>,
    %c0_43 = arith.constant 0 : index
    %c0_44 = arith.constant 0 : index
    %130 = vector.load %arg16[%c0_43, %c0_44] : memref<8x32xf32, #tpu.memory_space<vmem>>, vector<8x32xf32>
    %131 = arith.truncf %130 : vector<8x32xf32> to vector<8x32xbf16>
    %c0_45 = arith.constant 0 : index
    %c0_46 = arith.constant 0 : index
    %132 = vector.load %arg7[%c0_45, %c0_46] : memref<32x32xbf16, #tpu.memory_space<vmem>>, vector<32x32xbf16>
    %cst_47 = arith.constant dense<0.000000e+00> : vector<8x32xf32>
    %133 = tpu.matmul %131, %132, %cst_47 {dimension_numbers = #tpu.dot_dimension_numbers<[1], [0], [0], [1], [0, 0, 1, 1], [], []>} : vector<8x32xbf16>, vector<32x32xbf16>, vector<8x32xf32> -> vector<8x32xf32>
    %c0_48 = arith.constant 0 : index
    %c0_49 = arith.constant 0 : index
    %134 = vector.load %arg8[%c0_48, %c0_49] : memref<1x32xf32, #tpu.memory_space<vmem>>, vector<1x32xf32>
    %135 = vector.broadcast %134 : vector<1x32xf32> to vector<8x32xf32>
    %136 = arith.addf %133, %135 : vector<8x32xf32>
    %137 = arith.addf %1, %136 : vector<8x32xf32>
    %c0_50 = arith.constant 0 : index
    %c0_51 = arith.constant 0 : index
    %138 = vector.load %arg9[%c0_50, %c0_51] : memref<1x32xf32, #tpu.memory_space<vmem>>, vector<1x32xf32>
    %c0_52 = arith.constant 0 : index
    %c0_53 = arith.constant 0 : index
    %139 = vector.load %arg10[%c0_52, %c0_53] : memref<1x32xf32, #tpu.memory_space<vmem>>, vector<1x32xf32>
    %cst_54 = arith.constant dense<0.000000e+00> : vector<8xf32>
    %140 = vector.multi_reduction <add>, %137, %cst_54 [1] : vector<8x32xf32> to vector<8xf32>
    %141 = vector.shape_cast %140 : vector<8xf32> to vector<8x1xf32>
    %cst_55 = arith.constant 3.200000e+01 : f32
    %142 = vector.broadcast %cst_55 : f32 to vector<8x1xf32>
    %143 = arith.divf %141, %142 : vector<8x1xf32>
    %144 = vector.broadcast %143 : vector<8x1xf32> to vector<8x32xf32>
    %145 = arith.subf %137, %144 : vector<8x32xf32>
    %146 = arith.mulf %145, %145 : vector<8x32xf32>
    %cst_56 = arith.constant dense<0.000000e+00> : vector<8xf32>
    %147 = vector.multi_reduction <add>, %146, %cst_56 [1] : vector<8x32xf32> to vector<8xf32>
    %148 = vector.shape_cast %147 : vector<8xf32> to vector<8x1xf32>
    %cst_57 = arith.constant 3.200000e+01 : f32
    %149 = vector.broadcast %cst_57 : f32 to vector<8x1xf32>
    %150 = arith.divf %148, %149 : vector<8x1xf32>
    %151 = vector.broadcast %143 : vector<8x1xf32> to vector<8x32xf32>
    %152 = arith.subf %137, %151 : vector<8x32xf32>
    %cst_58 = arith.constant 9.99999974E-6 : f32
    %153 = vector.broadcast %cst_58 : f32 to vector<8x1xf32>
    %154 = arith.addf %150, %153 : vector<8x1xf32>
    %155 = math.rsqrt %154 : vector<8x1xf32>
    %156 = vector.broadcast %155 : vector<8x1xf32> to vector<8x32xf32>
    %157 = arith.mulf %152, %156 : vector<8x32xf32>
    %158 = vector.broadcast %138 : vector<1x32xf32> to vector<8x32xf32>
    %159 = arith.mulf %157, %158 : vector<8x32xf32>
    %160 = vector.broadcast %139 : vector<1x32xf32> to vector<8x32xf32>
    %161 = arith.addf %159, %160 : vector<8x32xf32>
    %162 = arith.truncf %161 : vector<8x32xf32> to vector<8x32xbf16>
    %c0_59 = arith.constant 0 : index
    %c0_60 = arith.constant 0 : index
    %163 = vector.load %arg11[%c0_59, %c0_60] : memref<32x64xbf16, #tpu.memory_space<vmem>>, vector<32x64xbf16>
    %cst_61 = arith.constant dense<0.000000e+00> : vector<8x64xf32>
    %164 = tpu.matmul %162, %163, %cst_61 {dimension_numbers = #tpu.dot_dimension_numbers<[1], [0], [0], [1], [0, 0, 1, 1], [], []>} : vector<8x32xbf16>, vector<32x64xbf16>, vector<8x64xf32> -> vector<8x64xf32>
    %c0_62 = arith.constant 0 : index
    %c0_63 = arith.constant 0 : index
    %165 = vector.load %arg12[%c0_62, %c0_63] : memref<1x64xf32, #tpu.memory_space<vmem>>, vector<1x64xf32>
    %166 = vector.broadcast %165 : vector<1x64xf32> to vector<8x64xf32>
    %167 = arith.addf %164, %166 : vector<8x64xf32>
    %cst_64 = arith.constant 1.702000e+00 : f32
    %168 = vector.broadcast %cst_64 : f32 to vector<8x64xf32>
    %169 = arith.mulf %168, %167 : vector<8x64xf32>
    %170 = arith.negf %169 : vector<8x64xf32>
    %171 = math.exp %170 : vector<8x64xf32>
    %cst_65 = arith.constant 1.000000e+00 : f32
    %172 = vector.broadcast %cst_65 : f32 to vector<8x64xf32>
    %173 = arith.addf %172, %171 : vector<8x64xf32>
    %174 = arith.divf %172, %173 : vector<8x64xf32>
    %175 = arith.mulf %167, %174 : vector<8x64xf32>
    %176 = arith.truncf %175 : vector<8x64xf32> to vector<8x64xbf16>
    %c0_66 = arith.constant 0 : index
    %c0_67 = arith.constant 0 : index
    %177 = vector.load %arg13[%c0_66, %c0_67] : memref<64x32xbf16, #tpu.memory_space<vmem>>, vector<64x32xbf16>
    %cst_68 = arith.constant dense<0.000000e+00> : vector<8x32xf32>
    %178 = tpu.matmul %176, %177, %cst_68 {dimension_numbers = #tpu.dot_dimension_numbers<[1], [0], [0], [1], [0, 0, 1, 1], [], []>} : vector<8x64xbf16>, vector<64x32xbf16>, vector<8x32xf32> -> vector<8x32xf32>
    %c0_69 = arith.constant 0 : index
    %c0_70 = arith.constant 0 : index
    %179 = vector.load %arg14[%c0_69, %c0_70] : memref<1x32xf32, #tpu.memory_space<vmem>>, vector<1x32xf32>
    %180 = vector.broadcast %179 : vector<1x32xf32> to vector<8x32xf32>
    %181 = arith.addf %178, %180 : vector<8x32xf32>
    %182 = arith.addf %137, %181 : vector<8x32xf32>
    %c0_71 = arith.constant 0 : index
    %c0_72 = arith.constant 0 : index
    %c0_73 = arith.constant 0 : index
    %183 = vector.load %arg15[%c0_71, %c0_72, %c0_73] : memref<1x8x32xf32, #tpu.memory_space<vmem>>, vector<1x8x32xf32>
    %184 = vector.shape_cast %183 : vector<1x8x32xf32> to vector<8x32xf32>
    %185 = vector.shape_cast %182 : vector<8x32xf32> to vector<1x8x32xf32>
    tpu.vector_store %arg15[%c0_71, %c0_72, %c0_73], %185 {strides = array<i32>} : memref<1x8x32xf32, #tpu.memory_space<vmem>>, vector<1x8x32xf32>,
    return
  }
  func.func @transform_0(%arg0: i32) -> (i32, i32, i32) {
    %c0_i32 = arith.constant 0 : i32
    %c0_i32_0 = arith.constant 0 : i32
    %c0_i32_1 = arith.constant 0 : i32
    return %arg0, %c0_i32, %c0_i32_0 : i32, i32, i32
  }
  func.func @transform_1(%arg0: i32) -> (i32, i32, i32) {
    %c0_i32 = arith.constant 0 : i32
    %c0_i32_0 = arith.constant 0 : i32
    %c0_i32_1 = arith.constant 0 : i32
    return %arg0, %c0_i32, %c0_i32_0 : i32, i32, i32
  }
  func.func @transform_2(%arg0: i32) -> (i32, i32) {
    %c0_i32 = arith.constant 0 : i32
    %c0_i32_0 = arith.constant 0 : i32
    %c0_i32_1 = arith.constant 0 : i32
    return %c0_i32, %c0_i32_0 : i32, i32
  }
  func.func @transform_3(%arg0: i32) -> (i32, i32) {
    %c0_i32 = arith.constant 0 : i32
    %c0_i32_0 = arith.constant 0 : i32
    %c0_i32_1 = arith.constant 0 : i32
    return %c0_i32, %c0_i32_0 : i32, i32
  }
  func.func @transform_4(%arg0: i32) -> (i32, i32) {
    %c0_i32 = arith.constant 0 : i32
    %c0_i32_0 = arith.constant 0 : i32
    %c0_i32_1 = arith.constant 0 : i32
    return %c0_i32, %c0_i32_0 : i32, i32
  }
  func.func @transform_5(%arg0: i32) -> (i32, i32) {
    %c0_i32 = arith.constant 0 : i32
    %c0_i32_0 = arith.constant 0 : i32
    %c0_i32_1 = arith.constant 0 : i32
    return %c0_i32, %c0_i32_0 : i32, i32
  }
  func.func @transform_6(%arg0: i32) -> (i32, i32) {
    %c0_i32 = arith.constant 0 : i32
    %c0_i32_0 = arith.constant 0 : i32
    %c0_i32_1 = arith.constant 0 : i32
    return %c0_i32, %c0_i32_0 : i32, i32
  }
  func.func @transform_7(%arg0: i32) -> (i32, i32) {
    %c0_i32 = arith.constant 0 : i32
    %c0_i32_0 = arith.constant 0 : i32
    %c0_i32_1 = arith.constant 0 : i32
    return %c0_i32, %c0_i32_0 : i32, i32
  }
  func.func @transform_8(%arg0: i32) -> (i32, i32) {
    %c0_i32 = arith.constant 0 : i32
    %c0_i32_0 = arith.constant 0 : i32
    %c0_i32_1 = arith.constant 0 : i32
    return %c0_i32, %c0_i32_0 : i32, i32
  }
  func.func @transform_9(%arg0: i32) -> (i32, i32) {
    %c0_i32 = arith.constant 0 : i32
    %c0_i32_0 = arith.constant 0 : i32
    %c0_i32_1 = arith.constant 0 : i32
    return %c0_i32, %c0_i32_0 : i32, i32
  }
  func.func @transform_10(%arg0: i32) -> (i32, i32) {
    %c0_i32 = arith.constant 0 : i32
    %c0_i32_0 = arith.constant 0 : i32
    %c0_i32_1 = arith.constant 0 : i32
    return %c0_i32, %c0_i32_0 : i32, i32
  }
  func.func @transform_11(%arg0: i32) -> (i32, i32) {
    %c0_i32 = arith.constant 0 : i32
    %c0_i32_0 = arith.constant 0 : i32
    %c0_i32_1 = arith.constant 0 : i32
    return %c0_i32, %c0_i32_0 : i32, i32
  }
  func.func @transform_12(%arg0: i32) -> (i32, i32) {
    %c0_i32 = arith.constant 0 : i32
    %c0_i32_0 = arith.constant 0 : i32
    %c0_i32_1 = arith.constant 0 : i32
    return %c0_i32, %c0_i32_0 : i32, i32
  }
  func.func @transform_13(%arg0: i32) -> (i32, i32) {
    %c0_i32 = arith.constant 0 : i32
    %c0_i32_0 = arith.constant 0 : i32
    %c0_i32_1 = arith.constant 0 : i32
    return %c0_i32, %c0_i32_0 : i32, i32
  }
  func.func @transform_14(%arg0: i32) -> (i32, i32, i32) {
    %c0_i32 = arith.constant 0 : i32
    %c0_i32_0 = arith.constant 0 : i32
    %c0_i32_1 = arith.constant 0 : i32
    return %arg0, %c0_i32, %c0_i32_0 : i32, i32, i32
  }
}

</mosaic_0001>

<bundles_post_ra>
// kernel: _lambda_.11
= control target key start
LH: loop header
LB: loop body
LE: loop exit
PB: predicated region body
PF: predicated region fallthrough
CT: control target
= control target key end

     0   :  { %v188_v0 = vmov 0   ;;  %vm112_vm0 = vcmask 523264   ;;  %vm156_vm1 = vcmask 261120   ;;  %s249_s1 = inlined_call_operand.vmem [shape: bf16[192,32], index: 1, kind: input, shape index: {}]   ;;  %s250_s0 = inlined_call_operand.vmem [shape: f32[8,192], index: 0, kind: input, shape index: {}]   ;;  %s251_s2 = inlined_call_operand.vmem [shape: f32[8,32], index: 2, kind: output, shape index: {}]  }
   0x1   :  { %116 = vmatprep.subr.bf16.mxu0 %v188_v0  ;;  %v176_v1 = vld [vmem:[%s249_s1] sm:$0xff]   ;;  %v177_v2 = vld [vmem:[%s249_s1 + $0x8] sm:$0xff]   ;;  %v178_v3 = vld [vmem:[%s249_s1 + $0x10] sm:$0xff]  }
   0x2   :  { %117 = vmatpush1.bf16.msra.mxu0 %v176_v1  ;;  %v179_v4 = vld [vmem:[%s249_s1 + $0x18] sm:$0xff]   ;;  %v13_v5 = vld [vmem:[%s250_s0 + $0x8] sm:$0xff]  ;;  %v180_v7 = vld [vmem:[%s249_s1 + $0x20] sm:$0xff]  }
   0x3   :  { %118 = vmatprep.subr.bf16.mxu0 %v188_v0  ;;  %v15_v6 = vpack.c.bf16 %v13_v5, %v13_v5  ;;  %v181_v8 = vld [vmem:[%s249_s1 + $0x28] sm:$0xff]   ;;  %v182_v9 = vld [vmem:[%s249_s1 + $0x30] sm:$0xff]   ;;  %v183_v10 = vld [vmem:[%s249_s1 + $0x38] sm:$0xff]  }
   0x4   :  { %v184_v11 = vld [vmem:[%s249_s1 + $0x40] sm:$0xff]   ;;  %v185_v12 = vld [vmem:[%s249_s1 + $0x48] sm:$0xff]   ;;  %v186_v13 = vld [vmem:[%s249_s1 + $0x50] sm:$0xff]  }
   0x5   :  { %174 = vmatprep.mubr.msk.bf16.mxu0 %vm112_vm0, %v15_v6  ;;  %v187_v14 = vld [vmem:[%s249_s1 + $0x58] sm:$0xff]   ;;  %v12_v15 = vld [vmem:[%s250_s0] sm:$0xff] }
   0x6   :  { %119 = vmatpush1.bf16.msra.mxu0 %v177_v2  ;;  %v14_v16 = vpack.c.bf16 %v12_v15, %v12_v15 }
   0x7   :  { %120 = vmatprep.subr.bf16.mxu0 %v188_v0 }
   0xa   :  { %121 = vmatpush1.bf16.msra.mxu0 %v178_v3 }
   0xb   :  { %122 = vmatprep.subr.bf16.mxu0 %v188_v0 }
   0xe   :  { %123 = vmatpush1.bf16.msra.mxu0 %v179_v4 }
   0xf   :  { %124 = vmatprep.subr.bf16.mxu0 %v188_v0 }
  0x12   :  { %125 = vmatpush1.bf16.msra.mxu0 %v180_v7 }
  0x13   :  { %126 = vmatprep.subr.bf16.mxu0 %v188_v0 }
  0x16   :  { %127 = vmatpush1.bf16.msra.mxu0 %v181_v8 }
  0x17   :  { %128 = vmatprep.subr.bf16.mxu0 %v188_v0 }
  0x1a   :  { %129 = vmatpush1.bf16.msra.mxu0 %v182_v9 }
  0x1b   :  { %130 = vmatprep.subr.bf16.mxu0 %v188_v0 }
  0x1e   :  { %131 = vmatpush1.bf16.msra.mxu0 %v183_v10 }
  0x1f   :  { %132 = vmatprep.subr.bf16.mxu0 %v188_v0 }
  0x22   :  { %133 = vmatpush1.bf16.msra.mxu0 %v184_v11 }
  0x23   :  { %134 = vmatprep.subr.bf16.mxu0 %v188_v0 }
  0x26   :  { %135 = vmatpush1.bf16.msra.mxu0 %v185_v12 }
  0x27   :  { %136 = vmatprep.subr.bf16.mxu0 %v188_v0 }
  0x2a   :  { %137 = vmatpush1.bf16.msra.mxu0 %v186_v13 }
  0x2b   :  { %138 = vmatprep.subr.bf16.mxu0 %v188_v0 }
  0x2e   :  { %139 = vmatpush1.bf16.msra.mxu0 %v187_v14 }
  0x31   :  { %149 = vmatmul.mubr.bf16.vlgmr.msra.gmra.mrb[0].mxu0 %v14_v16 }
 0x104   :  { %v150_v17 = vpop.f32.mrb[0].mxu0 }
 0x105   :  { %157 = vst.msk [vmem:[%s251_s2] sm:$0xff] %vm156_vm1, %v150_v17  ;;  %v152_v18 = vpop.f32.mrb[1].mxu0 }
 0x106   :  { %v153_v19 = vpop.f32.mrb[2].mxu0 }
 0x107   :  { %v154_v20 = vpop.f32.mrb[3].mxu0 }

// kernel: _lambda_.12
= control target key start
LH: loop header
LB: loop body
LE: loop exit
PB: predicated region body
PF: predicated region fallthrough
CT: control target
= control target key end

     0   :  { %vm18_vm0 = vcmask 261120   ;;  %vm22_vm1 = vcmask 254976   ;;  %s119_s0 = inlined_call_operand.vmem [shape: f32[10,32], index: 0, kind: input, shape index: {}]   ;;  %s120_s1 = inlined_call_operand.vmem [shape: f32[1,32], index: 1, kind: input, shape index: {}]   ;;  %s121_s2 = inlined_call_operand.vmem [shape: f32[1,32], index: 2, kind: input, shape index: {}]   ;;  %s122_s3 = inlined_call_operand.vmem [shape: f32[10,32], index: 3, kind: output, shape index: {}]  }
   0x1   :  { %v14_v0 = vld [vmem:[%s119_s0] sm:$0xff]  ;;  %v15_v1 = vld [vmem:[%s119_s0 + $0x8] sm:$0x3] }
   0x2   :  { %v19_v2 = vsel %vm18_vm0, %v14_v0, 0.0  ;;  %v23_v3 = vsel %vm22_vm1, %v15_v1, 0.0  ;;  %v69_v21 = vld [vmem:[%s120_s1] ss:$0 sm:$0xff] }
   0x3   :  { %20 = vadd.xlane.f32.xlu0 %v19_v2  ;;  %v70_v23 = vld [vmem:[%s121_s2] ss:$0 sm:$0xff] }
   0x7   :  { %24 = vadd.xlane.f32.xlu0 %v23_v3 }
  0x90   :  { %v21_v4 = vpop.xlane.xlu0 %20 }
  0x91   :  { %v27_v5 = vmul.f32 0.03125, %v21_v4 }
  0x93   :  { %v29_v6 = vsub.f32 %v14_v0, %v27_v5 }
  0x94   :  { %v25_v7 = vpop.xlane.xlu0 %24 }
  0x95   :  { %v28_v8 = vmul.f32 0.03125, %v25_v7  ;;  %v31_v9 = vmul.f32 %v29_v6, %v29_v6 }
  0x97   :  { %v30_v10 = vsub.f32 %v15_v1, %v28_v8  ;;  %v33_v11 = vsel %vm18_vm0, %v31_v9, 0.0 }
  0x98   :  { %34 = vadd.xlane.f32.xlu1 %v33_v11 }
  0x99   :  { %v32_v12 = vmul.f32 %v30_v10, %v30_v10 }
  0x9b   :  { %v36_v13 = vsel %vm22_vm1, %v32_v12, 0.0 }
  0x9c   :  { %37 = vadd.xlane.f32.xlu1 %v36_v13 }
 0x125   :  { %v35_v14 = vpop.xlane.xlu1 %34 }
 0x126   :  { %v39_v15 = vmul.f32 0.03125, %v35_v14 }
 0x128   :  { %v41_v16 = vadd.f32 1e-05, %v39_v15 }
 0x129   :  { %v38_v17 = vpop.xlane.xlu1 %37 }
 0x12a   :  { %71 = vrsqrt.f32 %v41_v16  ;;  %v40_v18 = vmul.f32 0.03125, %v38_v17 }
 0x12c   :  { %v42_v19 = vadd.f32 1e-05, %v40_v18 }
 0x12e   :  { %73 = vrsqrt.f32 %v42_v19 }
 0x134   :  { %v72_v20 = vpop.eup %71 }
 0x135   :  { %v45_v22 = vmul.f32 %v72_v20, %v29_v6 }
 0x137   :  { %v53_v24 = vmul.f32 %v69_v21, %v45_v22 }
 0x138   :  { %v74_v25 = vpop.eup %73 }
 0x139   :  { %v61_v26 = vadd.f32 %v70_v23, %v53_v24  ;;  %v46_v27 = vmul.f32 %v74_v25, %v30_v10 }
 0x13b   :  { %63 = vst.msk [vmem:[%s122_s3] sm:$0xff] %vm18_vm0, %v61_v26  ;;  %v54_v28 = vmul.f32 %v69_v21, %v46_v27 }
 0x13d   :  { %v62_v29 = vadd.f32 %v70_v23, %v54_v28 }
 0x13f   :  { %64 = vst.msk [vmem:[%s122_s3 + $0x8] sm:$0x3] %vm22_vm1, %v62_v29 }

// kernel: _lambda_.15
= control target key start
LH: loop header
LB: loop body
LE: loop exit
PB: predicated region body
PF: predicated region fallthrough
CT: control target
= control target key end

     0   :  { %vm22_vm0 = vcmask 254976   ;;  %s241_s0 = inlined_call_operand.vmem [shape: f32[2,32], index: 0, kind: input, shape index: {}]   ;;  %s242_s1 = inlined_call_operand.vmem [shape: f32[1,32], index: 1, kind: input, shape index: {}]   ;;  %s243_s2 = inlined_call_operand.vmem [shape: f32[1,32], index: 2, kind: input, shape index: {}]   ;;  %s244_s3 = inlined_call_operand.vmem [shape: bf16[32,32], index: 3, kind: input, shape index: {}]   ;;  %s245_s4 = inlined_call_operand.hbm [shape: f32[2,32], index: 4, kind: output, shape index: {}]  }
   0x1   :  { %v19_v0 = vld [vmem:[%s241_s0] sm:$0x3] }
   0x2   :  { %v23_v1 = vsel %vm22_vm0, %v19_v0, 0.0 }
   0x3   :  { %24 = vadd.xlane.f32.xlu0 %v23_v1 }
   0x4   :  { %9 = vsyncpa [#allocation3], 0  ;;  %v152_v7 = vld [vmem:[%s244_s3] sm:$0xff]   ;;  %v182_v8 = vmov 0.0   ;;  %v153_v9 = vld [vmem:[%s244_s3 + $0x8] sm:$0xff]   ;;  %vm183_vm1 = vmmov 0  }
   0x5   :  { %141 = vmatprep.subr.bf16.mxu0 %v182_v8  ;;  %145 = vmatprep.mubr.msk.bf16.mxu0 %vm183_vm1, %v182_v8  ;;  %v133_v14 = vld [vmem:[%s242_s1] ss:$0 sm:$0xff]  ;;  %vm68_vm2 = vcmask 261120   ;;  %s184_s1 = smov [#allocation2]  }
   0x6   :  { %142 = vmatpush3.bf16.msra.mxu0 %v152_v7  ;;  %v134_v16 = vld [vmem:[%s243_s2] ss:$0 sm:$0xff]  ;;  %s125_s3 = sshll.u32 %s184_s1, 4  ;;  %s126_s3 = int_to_ptr.vmem [resolvable:$true] %s125_s3 }
   0x7   :  { %143 = vmatprep.subr.bf16.mxu0 %v182_v8  ;;  %s158_s2 = scalar_lea.vmem %s126_s3, 32  ;;  %p163_p1 = scmp.lt.s32.totalorder %s126_s3, %s126_s3 }
   0x8   :  { %p159_p0 = scmp.ne.s32.totalorder %s126_s3, %s158_s2  ;;  %p164_p2 = scmp.lt.s32.totalorder %s158_s2, %s158_s2 }
   0xa   :  { %144 = vmatpush3.bf16.msra.mxu0 %v153_v9  ;;  %p165_p3 = por %p164_p2, %p163_p1 }
   0xc   :  { %p166_p4 = pnand %p165_p3, %p159_p0 }
  0x90   :  { %v25_v2 = vpop.xlane.xlu0 %24 }
  0x91   :  { %v27_v3 = vmul.f32 0.03125, %v25_v2 }
  0x93   :  { %v28_v4 = vsub.f32 %v19_v0, %v27_v3 }
  0x95   :  { %v29_v5 = vmul.f32 %v28_v4, %v28_v4 }
  0x97   :  { %v30_v6 = vsel %vm22_vm0, %v29_v5, 0.0 }
  0x98   :  { %31 = vadd.xlane.f32.xlu0 %v30_v6 }
 0x125   :  { %v32_v10 = vpop.xlane.xlu0 %31 }
 0x126   :  { %v33_v11 = vmul.f32 0.03125, %v32_v10 }
 0x128   :  { %v34_v12 = vadd.f32 1e-05, %v33_v11 }
 0x12a   :  { %154 = vrsqrt.f32 %v34_v12 }
 0x134   :  { %v155_v13 = vpop.eup %154 }
 0x135   :  { %v36_v15 = vmul.f32 %v155_v13, %v28_v4 }
 0x137   :  { %v43_v17 = vmul.f32 %v133_v14, %v36_v15 }
 0x139   :  { %v50_v18 = vadd.f32 %v134_v16, %v43_v17 }
 0x13b   :  { %v51_v19 = vpack.c.bf16 %v50_v18, %v50_v18 }
 0x13d   :  { %146 = vmatmul.mubr.msk.bf16.vlgmr.msra.gmra.mrb[0].mxu0 %vm68_vm2, %v51_v19 }
 0x210   :  { %v106_v20 = vpop.f32.mrb[0].mxu0 }
 0x211   :  { %v147_v21 = vpop.f32.mrb[1].mxu0  ;;  %v112_v22 = vmul.f32 %v106_v20, %v106_v20 }
 0x212   :  { %v109_v23 = vpop.f32.mrb[2].mxu0 }
 0x213   :  { %v148_v24 = vpop.f32.mrb[3].mxu0  ;;  %v113_v25 = vsel %vm22_vm0, %v112_v22, 0.0 }
 0x214   :  { %114 = vadd.xlane.f32.xlu1 %v113_v25 }
 0x2a1   :  { %v115_v26 = vpop.xlane.xlu1 %114 }
 0x2a2   :  { %156 = vrsqrt.f32 %v115_v26 }
 0x2ac   :  { %v157_v27 = vpop.eup %156 }
 0x2ad   :  { %v117_v28 = vmul.f32 %v157_v27, %v106_v20 }
 0x2af   :  { %118 = vst.msk [vmem:[#allocation2] sm:$0x3] %vm22_vm0, %v117_v28 }
 0x2b0   :  { %169 = shalt.err (!%p166_p4)
}
 0x2b1   :  { %s170_s26 = scalar_lea.hbm %s245_s4, 32 }
 0x2b2   :  { %p171_p5 = scmp.ne.s32.totalorder %s245_s4, %s170_s26  ;;  %p174_p6 = scmp.lt.u32.totalorder %s170_s26, %s245_s4 }
 0x2b4   :  { %p176_p7 = pnand %p174_p6, %p171_p5 }
 0x2b6   :  { %179 = shalt.err (!%p176_p7)
}
 0x2b7   :  { %128 = dma.vmem_to_hbm [thread:$0]  %s126_s3, 32, %s245_s4, [#allocation3]  }
 0x2b8   :  { %180 = dma.done.wait [#allocation3], 32  }
 0x2b9   :  { %181 = vsyncadd [#allocation3], 4294967264 }
 0x2ba   :  { %132 = vsyncpa [#allocation3], 1 }

// kernel: _lambda_.13
= control target key start
LH: loop header
LB: loop body
LE: loop exit
PB: predicated region body
PF: predicated region fallthrough
CT: control target
= control target key end

     0   :  { %s1624_s25 = smov 0   ;;  %s1791_s0 = inlined_call_operand.vmem [shape: f32[2,5,32], index: 0, kind: input, shape index: {}]   ;;  %s1792_s1 = inlined_call_operand.vmem [shape: f32[1,32], index: 1, kind: input, shape index: {}, may-alias: {1,7}]   ;;  %s1793_s2 = inlined_call_operand.vmem [shape: f32[1,32], index: 2, kind: input, shape index: {}, may-alias: {2,6,8,12}]   ;;  %s1794_s3 = inlined_call_operand.vmem [shape: bf16[32,96], index: 3, kind: input, shape index: {}]   ;;  %s1795_s4 = inlined_call_operand.vmem [shape: f32[1,96], index: 4, kind: input, shape index: {}]   ;;  %s1796_s5 = inlined_call_operand.vmem [shape: bf16[32,32], index: 5, kind: input, shape index: {}]   ;;  %s1797_s6 = inlined_call_operand.vmem [shape: f32[1,32], index: 6, kind: input, shape index: {}, may-alias: {2,6,8,12}]   ;;  %s1798_s7 = inlined_call_operand.vmem [shape: f32[1,32], index: 7, kind: input, shape index: {}, may-alias: {1,7}]   ;;  %s1799_s8 = inlined_call_operand.vmem [shape: f32[1,32], index: 8, kind: input, shape index: {}, may-alias: {2,6,8,12}]   ;;  %s1800_s9 = inlined_call_operand.vmem [shape: bf16[32,64], index: 9, kind: input, shape index: {}]   ;;  %s1801_s10 = inlined_call_operand.vmem [shape: f32[1,64], index: 10, kind: input, shape index: {}]   ;;  %s1802_s11 = inlined_call_operand.vmem [shape: bf16[64,32], index: 11, kind: input, shape index: {}]   ;;  %s1803_s12 = inlined_call_operand.vmem [shape: f32[1,32], index: 12, kind: input, shape index: {}, may-alias: {2,6,8,12}]   ;;  %s1804_s13 = inlined_call_operand.vmem [shape: f32[2,5,32], index: 13, kind: output, shape index: {}]  }
   0x1 LB: > { %s1316_s26 = sadd.s32 4294967295, %s1535_s25   ;;  %p1320_p0 = scmp.ge.s32.totalorder %s1535_s25, 1  ;;  %s1535_s25 = sphi %s1624_s25, %s23_s25  }
   0x2   : > { %p386_p1 = scmp.lt.s32.totalorder %s1535_s25, 3 }
   0x4   : > { %p387_p2 = pnand %p1320_p0, %p386_p1 }
   0x5   : > { %p428_p3 = scmp.lt.s32.totalorder (!%p387_p2), %s1316_s26, 1  ;;  %vm440_vm0 = vcmask (!%p387_p2), 258048   ;;  %v1495_v7 = vld [vmem:[%s1794_s3] sm:$0xff] (!%p387_p2)   ;;  %v1537_v8 = vmov (!%p387_p2), 0.0   ;;  %vm1538_vm1 = vmmov (!%p387_p2), 0   ;;  %v1496_v9 = vld [vmem:[%s1794_s3 + $0x8] sm:$0xff] (!%p387_p2)  }
   0x6   : > { %390 = sbr.rel (%p387_p2) target bundleno = 2591 (0xa1f), region = 72  ;;  %1386 = vmatprep.subr.bf16.mxu0 (!%p387_p2), %v1537_v8  ;;  %1390 = vmatprep.mubr.msk.bf16.mxu0 (!%p387_p2), %vm1538_vm1, %v1537_v8  ;;  %v1323_v14 = vld [vmem:[%s1792_s1] ss:$0 sm:$0xff] (!%p387_p2)  ;;  %vm493_vm2 = vcmask (!%p387_p2), 261120   ;;  %s1539_s24 = smov (!%p387_p2), 120   ;;  %vm541_vm3 = vcmask (!%p387_p2), 64512  }
   0x7   : > { %1387 = vmatpush3.bf16.msra.mxu0 (!%p387_p2), %v1495_v7  ;;  %1394 = vmatprep.subr.bf16.mxu1 (!%p387_p2), %v1537_v8  ;;  %v1324_v16 = vld [vmem:[%s1793_s2] ss:$0 sm:$0xff] (!%p387_p2)  ;;  %s1540_s28 = smov (!%p387_p2), 96   ;;  %s1541_s29 = smov (!%p387_p2), 88   ;;  %vm588_vm4 = vcmask (!%p387_p2), 36864   ;;  %vm607_vm5 = vcmask (!%p387_p2), 1041408  }
   0x8   : > { %1388 = vmatprep.subr.bf16.mxu0 (!%p387_p2), %v1537_v8  ;;  %1396 = vmatprep.mubr.msk.bf16.mxu1 (!%p387_p2), %vm1538_vm1, %v1537_v8  ;;  %v1325_v20 = vld [vmem:[%s1795_s4] ss:$0 sm:$0xff] (!%p387_p2)  ;;  %s1543_s14 = smov (!%p387_p2), 112   ;;  %s1544_s15 = smov (!%p387_p2), 72   ;;  %vm608_vm6 = vcmask (!%p387_p2), 1042432   ;;  %vm603_vm7 = vcmask (!%p387_p2), 39936  }
   0x9   : > { %s1545_s16 = smov (!%p387_p2), 104   ;;  %s1546_s17 = smov (!%p387_p2), 56   ;;  %vm654_vm8 = vcmask (!%p387_p2), 61440   ;;  %vm770_vm9 = vcmask (!%p387_p2), 127040   ;;  %vm886_vm10 = vcmask (!%p387_p2), 192640   ;;  %vm1002_vm11 = vcmask (!%p387_p2), 258240  }
   0xa   : > { %s1547_s18 = smov (!%p387_p2), 64   ;;  %s1548_s19 = smov (!%p387_p2), 48   ;;  %vm1217_vm12 = vcmask (!%p387_p2), 523264  }
   0xb   : > { %1389 = vmatpush3.bf16.msra.mxu0 (!%p387_p2), %v1496_v9  ;;  %s1549_s20 = smov (!%p387_p2), 40   ;;  %s1551_s21 = smov (!%p387_p2), 8  }
   0xc   : > { %1400 = vmatprep.subr.bf16.mxu0 (!%p387_p2), %v1537_v8 }
   0xd   : > { %s1806_s26 = smov (!%p428_p3, %s1316_s26), 1 }
   0xe   : > { %s1321_s27 = sshll.u32 %s1806_s26, 3 }
   0xf   : > { %s431_s30 = scalar_lea.vmem %s1791_s0, %s1321_s27 }
  0x10   : > { %v1640_v0 = vld [vmem:[%s431_s30] sm:$0x1f]  ;;  %s1542_s30 = smov 80  }
  0x11   : > { %v441_v1 = vsel %vm440_vm0, %v1640_v0, 0.0 }
  0x12   : > { %442 = vadd.xlane.f32.xlu0 %v441_v1 }
  0x9f   : > { %v443_v2 = vpop.xlane.xlu0 %442 }
  0xa0   : > { %v445_v3 = vmul.f32 0.03125, %v443_v2 }
  0xa2   : > { %v446_v4 = vsub.f32 %v1640_v0, %v445_v3 }
  0xa4   : > { %v447_v5 = vmul.f32 %v446_v4, %v446_v4 }
  0xa6   : > { %v448_v6 = vsel %vm440_vm0, %v447_v5, 0.0 }
  0xa7   : > { %449 = vadd.xlane.f32.xlu0 %v448_v6 }
 0x134   : > { %v450_v10 = vpop.xlane.xlu0 %449 }
 0x135   : > { %v451_v11 = vmul.f32 0.03125, %v450_v10 }
 0x137   : > { %v452_v12 = vadd.f32 1e-05, %v451_v11 }
 0x139   : > { %1505 = vrsqrt.f32 %v452_v12 }
 0x143   : > { %v1506_v13 = vpop.eup %1505 }
 0x144   : > { %v454_v15 = vmul.f32 %v1506_v13, %v446_v4 }
 0x146   : > { %v461_v17 = vmul.f32 %v1323_v14, %v454_v15 }
 0x148   : > { %v468_v18 = vadd.f32 %v1324_v16, %v461_v17 }
 0x14a   : > { %v469_v19 = vpack.c.bf16 %v468_v18, %v468_v18  ;;  %v1550_v18 = vmov 65535  }
 0x14c   : > { %1391 = vmatmul.mubr.msk.bf16.vlgmr.msra.gmra.mrb[0].mxu0 %vm493_vm2, %v469_v19  ;;  %v609_v19 = vsel %vm607_vm5, 4294967295, %v1550_v18 }
 0x14d   : > { %1402 = vmatprep.mubr.msk.bf16.mxu0 %vm1538_vm1, %v1537_v8 }
 0x21f   : > { %v531_v21 = vpop.f32.mrb[0].mxu0 }
 0x220   : > { %v532_v22 = vadd.f32 %v1325_v20, %v531_v21  ;;  %v1392_v23 = vpop.f32.mrb[1].mxu0 }
 0x221   : > { %v534_v24 = vpop.f32.mrb[2].mxu0 }
 0x222   : > { %v1672_v25 = vpack.c.bf16 %v532_v22, %v532_v22  ;;  %v1393_v26 = vpop.f32.mrb[3].mxu0  ;;  %v610_v22 = vsel %vm608_vm6, %v609_v19, 0 }
 0x224   : > { %656 = vrot.lane.b32.xlu0 %v1672_v25, %s1539_s24  ;;  %539 = vrot.lane.b32.xlu1 %v1672_v25, %s1540_s28  ;;  %s435_s24 = scalar_lea.vmem %s1804_s13, %s1321_s27 }
 0x228   : > { %658 = vrot.lane.b32.xlu1 %v1672_v25, %s1541_s29  ;;  %s1552_s29 = smov 16  }
 0x22c   : > { %774 = vrot.lane.b32.xlu1 %v1672_v25, %s1542_s30  ;;  %s1553_s30 = smov 24  }
 0x230   : > { %772 = vrot.lane.b32.xlu1 %v1672_v25, %s1543_s14 }
 0x234   : > { %890 = vrot.lane.b32.xlu1 %v1672_v25, %s1544_s15 }
 0x238   : > { %888 = vrot.lane.b32.xlu1 %v1672_v25, %s1545_s16 }
 0x296   : > { %v540_v27 = vpop.permute.xlu1 %539  ;;  %v657_v32 = vpop.permute.xlu0 %656 }
 0x297   : > { %v546_v28 = vsel %vm541_vm3, %v540_v27, 0 }
 0x298   : > { %1395 = vmatpush3.bf16.xpose.msra.mxu1 %v546_v28 }
 0x299   : > { %1406 = vmatprep.subr.bf16.mxu1 %v1537_v8 }
 0x29a   : > { %v659_v29 = vpop.permute.xlu1 %658 }
 0x29b   : > { %v664_v30 = vsel %vm541_vm3, %v659_v29, 0 }
 0x29e   : > { %v775_v31 = vpop.permute.xlu1 %774 }
 0x29f   : > { %1397 = vmatmul.mubr.msk.bf16.vlgmr.msra.gmra.mrb[0].mxu1 %vm541_vm3, %v1672_v25  ;;  %v780_v34 = vsel %vm541_vm3, %v775_v31, 0 }
 0x2a0   : > { %1407 = vmatpush3.bf16.xpose.msra.mxu1 %v664_v30  ;;  %1408 = vmatprep.mubr.msk.bf16.mxu1 %vm1538_vm1, %v1537_v8 }
 0x2a1   : > { %1418 = vmatprep.subr.bf16.mxu1 %v1537_v8 }
 0x2a2   : > { %v773_v33 = vpop.permute.xlu1 %772 }
 0x2a6   : > { %v891_v35 = vpop.permute.xlu1 %890 }
 0x2a7   : > { %1409 = vmatmul.mubr.msk.bf16.vlgmr.msra.gmra.mrb[4].mxu1 %vm541_vm3, %v657_v32  ;;  %v896_v36 = vsel %vm541_vm3, %v891_v35, 0 }
 0x2a8   : > { %1419 = vmatpush3.bf16.xpose.msra.mxu1 %v780_v34  ;;  %1420 = vmatprep.mubr.msk.bf16.mxu1 %vm1538_vm1, %v1537_v8 }
 0x2a9   : > { %1430 = vmatprep.subr.bf16.mxu1 %v1537_v8 }
 0x2aa   : > { %v889_v37 = vpop.permute.xlu1 %888 }
 0x2af   : > { %1421 = vmatmul.mubr.msk.bf16.vlgmr.msra.gmra.mrb[8].mxu1 %vm541_vm3, %v773_v33 }
 0x2b0   : > { %1431 = vmatpush3.bf16.xpose.msra.mxu1 %v896_v36  ;;  %1432 = vmatprep.mubr.msk.bf16.mxu1 %vm1538_vm1, %v1537_v8 }
 0x2b1   : > { %1442 = vmatprep.subr.bf16.mxu1 %v1537_v8 }
 0x2b7   : > { %1433 = vmatmul.mubr.msk.bf16.vlgmr.msra.gmra.mrb[12].mxu1 %vm541_vm3, %v889_v37 }
 0x2b8   : > { %1446 = vmatprep.mubr.msk.bf16.mxu1 %vm1538_vm1, %v1537_v8 }
 0x372   : > { %v582_v38 = vpop.f32.mrb[0].mxu1 }
 0x373   : > { %v1398_v39 = vpop.f32.mrb[1].mxu1  ;;  %v589_v40 = vsel %vm588_vm4, %v582_v38, -inf }
 0x374   : > { %590 = vmax.xlane.f32.xlu1 %v589_v40  ;;  %v585_v41 = vpop.f32.mrb[2].mxu1 }
 0x375   : > { %v1399_v42 = vpop.f32.mrb[3].mxu1 }
 0x37a   : > { %v700_v43 = vpop.f32.mrb[4].mxu1 }
 0x37b   : > { %v1410_v44 = vpop.f32.mrb[5].mxu1  ;;  %v706_v45 = vsel %vm588_vm4, %v700_v43, -inf }
 0x37c   : > { %707 = vmax.xlane.f32.xlu0 %v706_v45  ;;  %v703_v46 = vpop.f32.mrb[6].mxu1 }
 0x37d   : > { %v1411_v47 = vpop.f32.mrb[7].mxu1 }
 0x382   : > { %v816_v48 = vpop.f32.mrb[8].mxu1 }
 0x383   : > { %v1422_v49 = vpop.f32.mrb[9].mxu1  ;;  %v822_v50 = vsel %vm588_vm4, %v816_v48, -inf }
 0x384   : > { %823 = vmax.xlane.f32.xlu1 %v822_v50  ;;  %v819_v51 = vpop.f32.mrb[10].mxu1 }
 0x385   : > { %v1423_v52 = vpop.f32.mrb[11].mxu1  ;;  %v1497_v51 = vld [vmem:[%s1796_s5] sm:$0xff]  }
 0x386   : > { %1443 = vmatpush3.bf16.msra.mxu1 %v1497_v51  ;;  %v1498_v52 = vld [vmem:[%s1796_s5 + $0x8] sm:$0xff]  }
 0x387   : > { %1444 = vmatprep.subr.bf16.mxu1 %v1537_v8 }
 0x38a   : > { %v932_v53 = vpop.f32.mrb[12].mxu1  ;;  %1445 = vmatpush3.bf16.msra.mxu1 %v1498_v52 }
 0x38b   : > { %v1434_v54 = vpop.f32.mrb[13].mxu1  ;;  %v938_v55 = vsel %vm588_vm4, %v932_v53, -inf  ;;  %1458 = vmatprep.subr.bf16.mxu1 %v1537_v8 }
 0x38c   : > { %939 = vmax.xlane.f32.xlu0 %v938_v55  ;;  %v935_v56 = vpop.f32.mrb[14].mxu1 }
 0x38d   : > { %v1435_v57 = vpop.f32.mrb[15].mxu1 }
 0x401   : > { %v591_v58 = vpop.xlane.xlu1 %590 }
 0x402   : > { %v592_v59 = vsub.f32 %v582_v38, %v591_v58 }
 0x404   : > { %v593_v60 = vmul.f32 1.442695, %v592_v59 }
 0x406   : > { %1507 = vpow2.f32 %v593_v60 }
 0x409   : > { %v708_v61 = vpop.xlane.xlu0 %707 }
 0x40a   : > { %v709_v62 = vsub.f32 %v700_v43, %v708_v61 }
 0x40c   : > { %v710_v63 = vmul.f32 1.442695, %v709_v62 }
 0x40e   : > { %1509 = vpow2.f32 %v710_v63 }
 0x410   : > { %v1508_v1 = vpop.eup %1507 }
 0x411   : > { %v595_v2 = vsel %vm588_vm4, %v1508_v1, 0.0  ;;  %v824_v5 = vpop.xlane.xlu1 %823 }
 0x412   : > { %596 = vadd.xlane.f32.xlu1 %v595_v2  ;;  %v825_v6 = vsub.f32 %v816_v48, %v824_v5 }
 0x414   : > { %v826_v9 = vmul.f32 1.442695, %v825_v6 }
 0x416   : > { %1511 = vpow2.f32 %v826_v9 }
 0x418   : > { %v1510_v3 = vpop.eup %1509 }
 0x419   : > { %v712_v4 = vsel %vm588_vm4, %v1510_v3, 0.0  ;;  %v940_v7 = vpop.xlane.xlu0 %939 }
 0x41a   : > { %713 = vadd.xlane.f32.xlu0 %v712_v4  ;;  %v941_v10 = vsub.f32 %v932_v53, %v940_v7 }
 0x41c   : > { %v942_v11 = vmul.f32 1.442695, %v941_v10 }
 0x41e   : > { %1513 = vpow2.f32 %v942_v11 }
 0x420   : > { %v1512_v12 = vpop.eup %1511 }
 0x421   : > { %v828_v13 = vsel %vm588_vm4, %v1512_v12, 0.0 }
 0x423   : > { %718 = vrot.lane.b32.xlu1 %v1672_v25, %s1546_s17 }
 0x428   : > { %v1514_v14 = vpop.eup %1513 }
 0x429   : > { %v944_v15 = vsel %vm588_vm4, %v1514_v14, 0.0 }
 0x430   : > { %601 = vrot.lane.b32.xlu0 %v1672_v25, %s1547_s18 }
 0x434   : > { %834 = vrot.lane.b32.xlu0 %v1672_v25, %s1548_s19 }
 0x447   : > { %829 = vadd.xlane.f32.xlu1 %v828_v13 }
 0x44b   : > { %945 = vadd.xlane.f32.xlu1 %v944_v15 }
 0x45c   : > { %950 = vrot.lane.b32.xlu1 %v1672_v25, %s1549_s20 }
 0x49f   : > { %v597_v16 = vpop.xlane.xlu1 %596 }
 0x4a0   : > { %1515 = vrcp.f32 %v597_v16 }
 0x4a3   : > { %v719_v26 = vpop.permute.xlu1 %718 }
 0x4a4   : > { %v724_v25 = vand.u32 %v719_v26, %v610_v22 }
 0x4a7   : > { %v714_v17 = vpop.xlane.xlu0 %713 }
 0x4a8   : > { %1517 = vrcp.f32 %v714_v17  ;;  %v1499_v17 = vld [vmem:[%s1800_s9] sm:$0xff]  }
 0x4aa   : > { %v1516_v20 = vpop.eup %1515 }
 0x4ab   : > { %v599_v21 = vmul.f32 %v1516_v20, %v1508_v1  ;;  %v602_v23 = vpop.permute.xlu0 %601 }
 0x4ac   : > { %v612_v24 = vand.u32 %v610_v22, %v602_v23 }
 0x4ad   : > { %v600_v27 = vpack.c.bf16 %v599_v21, %v599_v21 }
 0x4ae   : > { %1401 = vmatpush3.bf16.msra.mxu0 %v612_v24  ;;  %v1342_v24 = vld [vmem:[%s1799_s8] ss:$0 sm:$0xff] }
 0x4af   : > { %1412 = vmatprep.subr.bf16.mxu0 %v1537_v8  ;;  %v835_v30 = vpop.permute.xlu0 %834 }
 0x4b0   : > { %v840_v32 = vand.u32 %v835_v30, %v610_v22  ;;  %v1503_v30 = vld [vmem:[%s1802_s11 + $0x10] sm:$0xff]  }
 0x4b1   : > { %1403 = vmatmul.mubr.msk.bf16.vlgmr.msra.gmra.mrb[4].mxu0 %vm603_vm7, %v600_v27 }
 0x4b2   : > { %v1518_v28 = vpop.eup %1517  ;;  %1413 = vmatpush3.bf16.msra.mxu0 %v724_v25  ;;  %1414 = vmatprep.mubr.msk.bf16.mxu0 %vm1538_vm1, %v1537_v8 }
 0x4b3   : > { %v716_v29 = vmul.f32 %v1518_v28, %v1510_v3  ;;  %1424 = vmatprep.subr.bf16.mxu0 %v1537_v8  ;;  %v1337_v3 = vld [vmem:[%s1797_s6] ss:$0 sm:$0xff] }
 0x4b4   : > { %v1501_v28 = vld [vmem:[%s1802_s11] sm:$0xff]  }
 0x4b5   : > { %v717_v31 = vpack.c.bf16 %v716_v29, %v716_v29  ;;  %v1502_v29 = vld [vmem:[%s1802_s11 + $0x8] sm:$0xff]  }
 0x4b9   : > { %1415 = vmatmul.mubr.msk.bf16.vlgmr.msra.gmra.mrb[8].mxu0 %vm603_vm7, %v717_v31  ;;  %v1504_v31 = vld [vmem:[%s1802_s11 + $0x18] sm:$0xff]  }
 0x4ba   : > { %1425 = vmatpush3.bf16.msra.mxu0 %v840_v32  ;;  %1426 = vmatprep.mubr.msk.bf16.mxu0 %vm1538_vm1, %v1537_v8  ;;  %v1343_v32 = vld [vmem:[%s1801_s10] ss:$0 sm:$0xff] }
 0x4bb   : > { %1436 = vmatprep.subr.bf16.mxu0 %v1537_v8 }
 0x4d4   : > { %v830_v33 = vpop.xlane.xlu1 %829 }
 0x4d5   : > { %1519 = vrcp.f32 %v830_v33 }
 0x4d8   : > { %v946_v34 = vpop.xlane.xlu1 %945 }
 0x4d9   : > { %1521 = vrcp.f32 %v946_v34 }
 0x4dc   : > { %v951_v37 = vpop.permute.xlu1 %950 }
 0x4dd   : > { %v956_v40 = vand.u32 %v951_v37, %v610_v22  ;;  %v1341_v22 = vld [vmem:[%s1798_s7] ss:$0 sm:$0xff] }
 0x4df   : > { %v1520_v35 = vpop.eup %1519 }
 0x4e0   : > { %v832_v36 = vmul.f32 %v1520_v35, %v1512_v12 }
 0x4e2   : > { %v833_v38 = vpack.c.bf16 %v832_v36, %v832_v36 }
 0x4e3   : > { %v1522_v39 = vpop.eup %1521 }
 0x4e4   : > { %1427 = vmatmul.mubr.msk.bf16.vlgmr.msra.gmra.mrb[12].mxu0 %vm603_vm7, %v833_v38  ;;  %v948_v41 = vmul.f32 %v1522_v39, %v1514_v14 }
 0x4e5   : > { %1437 = vmatpush3.bf16.msra.mxu0 %v956_v40  ;;  %1438 = vmatprep.mubr.msk.bf16.mxu0 %vm1538_vm1, %v1537_v8 }
 0x4e6   : > { %1450 = vmatprep.subr.bf16.mxu0 %v1537_v8  ;;  %v949_v42 = vpack.c.bf16 %v948_v41, %v948_v41 }
 0x4ec   : > { %1439 = vmatmul.mubr.msk.bf16.vlgmr.msra.gmra.mrb[16].mxu0 %vm603_vm7, %v949_v42 }
 0x4ed   : > { %1454 = vmatprep.mubr.msk.bf16.mxu0 %vm1538_vm1, %v1537_v8  ;;  %1451 = vmatpush3.bf16.msra.mxu0 %v1499_v17 }
 0x4ee   : > { %1452 = vmatprep.subr.bf16.mxu0 %v1537_v8 }
 0x584   : > { %v648_v43 = vpop.f32.mrb[4].mxu0 }
 0x585   : > { %655 = vst.msk [vmem:[#allocation2] sm:$0x1f] %vm654_vm8, %v648_v43  ;;  %v1404_v44 = vpop.f32.mrb[5].mxu0 }
 0x586   : > { %v651_v45 = vpop.f32.mrb[6].mxu0  ;;  %v1348_v44 = vld [vmem:[%s1803_s12] ss:$0 sm:$0xff] }
 0x587   : > { %v1405_v46 = vpop.f32.mrb[7].mxu0 }
 0x58c   : > { %v760_v47 = vpop.f32.mrb[8].mxu0 }
 0x58d   : > { %767 = vrot.lane.b32.xlu0 %v760_v47, %s1551_s21  ;;  %v1416_v48 = vpop.f32.mrb[9].mxu0 }
 0x58e   : > { %v763_v49 = vpop.f32.mrb[10].mxu0 }
 0x58f   : > { %v1417_v50 = vpop.f32.mrb[11].mxu0 }
 0x5b7   : > { %v876_v53 = vpop.f32.mrb[12].mxu0 }
 0x5b8   : > { %883 = vrot.lane.b32.xlu1 %v876_v53, %s1552_s29  ;;  %v1428_v54 = vpop.f32.mrb[13].mxu0 }
 0x5b9   : > { %v879_v55 = vpop.f32.mrb[14].mxu0 }
 0x5ba   : > { %v1429_v56 = vpop.f32.mrb[15].mxu0 }
 0x5bf   : > { %v992_v57 = vpop.f32.mrb[16].mxu0 }
 0x5c0   : > { %999 = vrot.lane.b32.xlu0 %v992_v57, %s1553_s30  ;;  %v1440_v58 = vpop.f32.mrb[17].mxu0 }
 0x5c1   : > { %v995_v59 = vpop.f32.mrb[18].mxu0 }
 0x5c2   : > { %v1441_v60 = vpop.f32.mrb[19].mxu0 }
 0x5ff   : > { %v768_v61 = vpop.permute.xlu0 %767 }
 0x600   : > { %771 = vst.msk [vmem:[#allocation2] sm:$0x1f] %vm770_vm9, %v768_v61 }
 0x62a   : > { %v884_v62 = vpop.permute.xlu1 %883 }
 0x62b   : > { %887 = vst.msk [vmem:[#allocation2] sm:$0x1f] %vm886_vm10, %v884_v62 }
 0x632   : > { %v1000_v63 = vpop.permute.xlu0 %999 }
 0x633   : > { %1003 = vst.msk [vmem:[#allocation2] sm:$0x1f] %vm1002_vm11, %v1000_v63 }
 0x63a   : > { %v1004_v1 = vld [vmem:[#allocation2] sm:$0x1f] }
 0x63b   : > { %v1005_v2 = vpack.c.bf16 %v1004_v1, %v1004_v1 }
 0x63d   : > { %1447 = vmatmul.mubr.msk.bf16.vlgmr.msra.gmra.mrb[16].mxu1 %vm493_vm2, %v1005_v2 }
 0x63e   : > { %1466 = vmatprep.mubr.msk.bf16.mxu1 %vm1538_vm1, %v1537_v8  ;;  %1459 = vmatpush3.bf16.msra.mxu1 %v1501_v28 }
 0x63f   : > { %1460 = vmatprep.subr.bf16.mxu1 %v1537_v8 }
 0x642   : > { %1461 = vmatpush3.bf16.msra.mxu1 %v1502_v29 }
 0x643   : > { %1462 = vmatprep.subr.bf16.mxu1 %v1537_v8 }
 0x646   : > { %1463 = vmatpush3.bf16.msra.mxu1 %v1503_v30 }
 0x647   : > { %1464 = vmatprep.subr.bf16.mxu1 %v1537_v8 }
 0x64a   : > { %1465 = vmatpush3.bf16.msra.mxu1 %v1504_v31 }
 0x710   : > { %v1066_v4 = vpop.f32.mrb[16].mxu1 }
 0x711   : > { %v1067_v5 = vadd.f32 %v1337_v3, %v1066_v4  ;;  %v1448_v6 = vpop.f32.mrb[17].mxu1 }
 0x712   : > { %v1069_v7 = vpop.f32.mrb[18].mxu1 }
 0x713   : > { %v1072_v9 = vadd.f32 %v1067_v5, %v1640_v0  ;;  %v1449_v10 = vpop.f32.mrb[19].mxu1  ;;  %v1500_v0 = vld [vmem:[%s1800_s9 + $0x8] sm:$0xff]  }
 0x714   : > { %1453 = vmatpush3.bf16.msra.mxu0 %v1500_v0 }
 0x715   : > { %v1075_v11 = vsel %vm440_vm0, %v1072_v9, 0.0 }
 0x716   : > { %1076 = vadd.xlane.f32.xlu1 %v1075_v11 }
 0x7a3   : > { %v1077_v12 = vpop.xlane.xlu1 %1076 }
 0x7a4   : > { %v1078_v13 = vmul.f32 0.03125, %v1077_v12 }
 0x7a6   : > { %v1079_v14 = vsub.f32 %v1072_v9, %v1078_v13 }
 0x7a8   : > { %v1080_v15 = vmul.f32 %v1079_v14, %v1079_v14 }
 0x7aa   : > { %v1081_v16 = vsel %vm440_vm0, %v1080_v15, 0.0 }
 0x7ab   : > { %1082 = vadd.xlane.f32.xlu0 %v1081_v16 }
 0x838   : > { %v1083_v18 = vpop.xlane.xlu0 %1082 }
 0x839   : > { %v1084_v19 = vmul.f32 0.03125, %v1083_v18 }
 0x83b   : > { %v1085_v20 = vadd.f32 1e-05, %v1084_v19 }
 0x83d   : > { %1523 = vrsqrt.f32 %v1085_v20 }
 0x847   : > { %v1524_v21 = vpop.eup %1523 }
 0x848   : > { %v1087_v23 = vmul.f32 %v1524_v21, %v1079_v14 }
 0x84a   : > { %v1094_v26 = vmul.f32 %v1341_v22, %v1087_v23 }
 0x84c   : > { %v1101_v27 = vadd.f32 %v1342_v24, %v1094_v26 }
 0x84e   : > { %v1102_v25 = vpack.c.bf16 %v1101_v27, %v1101_v27 }
 0x850   : > { %1455 = vmatmul.mubr.msk.bf16.vlgmr.msra.gmra.mrb[20].mxu0 %vm493_vm2, %v1102_v25 }
 0x923   : > { %v1163_v33 = vpop.f32.mrb[20].mxu0 }
 0x924   : > { %v1164_v34 = vadd.f32 %v1343_v32, %v1163_v33  ;;  %v1456_v35 = vpop.f32.mrb[21].mxu0 }
 0x925   : > { %v1166_v36 = vpop.f32.mrb[22].mxu0 }
 0x926   : > { %v1347_v37 = vmul.f32 -1.702, %v1164_v34  ;;  %v1457_v38 = vpop.f32.mrb[23].mxu0 }
 0x928   : > { %v1171_v39 = vmul.f32 1.442695, %v1347_v37 }
 0x92a   : > { %1525 = vpow2.f32 %v1171_v39 }
 0x934   : > { %v1526_v40 = vpop.eup %1525 }
 0x935   : > { %v1173_v8 = vadd.f32 1.0, %v1526_v40 }
 0x937   : > { %1527 = vrcp.f32 %v1173_v8 }
 0x941   : > { %v1528_v41 = vpop.eup %1527 }
 0x942   : > { %v1176_v42 = vmul.f32 %v1528_v41, %v1164_v34 }
 0x944   : > { %v1177_v43 = vpack.c.bf16 %v1176_v42, %v1176_v42 }
 0x946   : > { %1467 = vmatmul.mubr.msk.bf16.vlgmr.msra.gmra.mrb[20].mxu1 %vm1217_vm12, %v1177_v43 }
 0xa19   : > { %v1255_v45 = vpop.f32.mrb[20].mxu1 }
 0xa1a   : > { %v1256_v46 = vadd.f32 %v1348_v44, %v1255_v45  ;;  %v1468_v47 = vpop.f32.mrb[21].mxu1 }
 0xa1b   : > { %v1258_v48 = vpop.f32.mrb[22].mxu1 }
 0xa1c   : > { %v1261_v49 = vadd.f32 %v1256_v46, %v1072_v9  ;;  %v1469_v50 = vpop.f32.mrb[23].mxu1 }
 0xa1e   : > { %1262 = vst.msk [vmem:[%s435_s24] sm:$0x1f] %vm440_vm0, %v1261_v49 }
 0xa1f PF: > { %s23_s25 = sadd.s32 1, %s1535_s25  }
 0xa20   : > { %p20_p4 = scmp.ge.s32.totalorder %s23_s25, 4  }
 0xa22   :  { %22 = sbr.rel (!%p20_p4) target bundleno = 1 (0x1), region = 102 }

// kernel: _lambda_.8
= control target key start
LH: loop header
LB: loop body
LE: loop exit
PB: predicated region body
PF: predicated region fallthrough
CT: control target
= control target key end

     0   :  { %s1688_s29 = smov 0   ;;  %s1864_s0 = inlined_call_operand.vmem [shape: f32[2,8,32], index: 0, kind: input, shape index: {}]   ;;  %s1865_s1 = inlined_call_operand.vmem [shape: f32[2,1,8], index: 1, kind: input, shape index: {}]   ;;  %s1866_s2 = inlined_call_operand.vmem [shape: f32[1,32], index: 2, kind: input, shape index: {}, may-alias: {2,8}]   ;;  %s1867_s3 = inlined_call_operand.vmem [shape: f32[1,32], index: 3, kind: input, shape index: {}, may-alias: {3,7,9,13}]   ;;  %s1868_s4 = inlined_call_operand.vmem [shape: bf16[32,96], index: 4, kind: input, shape index: {}]   ;;  %s1869_s5 = inlined_call_operand.vmem [shape: f32[1,96], index: 5, kind: input, shape index: {}]   ;;  %s1870_s6 = inlined_call_operand.vmem [shape: bf16[32,32], index: 6, kind: input, shape index: {}]   ;;  %s1871_s7 = inlined_call_operand.vmem [shape: f32[1,32], index: 7, kind: input, shape index: {}, may-alias: {3,7,9,13}]   ;;  %s1872_s8 = inlined_call_operand.vmem [shape: f32[1,32], index: 8, kind: input, shape index: {}, may-alias: {2,8}]   ;;  %s1873_s9 = inlined_call_operand.vmem [shape: f32[1,32], index: 9, kind: input, shape index: {}, may-alias: {3,7,9,13}]   ;;  %s1874_s10 = inlined_call_operand.vmem [shape: bf16[32,64], index: 10, kind: input, shape index: {}]   ;;  %s1875_s11 = inlined_call_operand.vmem [shape: f32[1,64], index: 11, kind: input, shape index: {}]   ;;  %s1876_s12 = inlined_call_operand.vmem [shape: bf16[64,32], index: 12, kind: input, shape index: {}]   ;;  %s1877_s13 = inlined_call_operand.vmem [shape: f32[1,32], index: 13, kind: input, shape index: {}, may-alias: {3,7,9,13}]   ;;  %s1878_s14 = inlined_call_operand.vmem [shape: f32[2,8,32], index: 14, kind: output, shape index: {}]  }
   0x1 LB: > { %s1375_s30 = sadd.s32 4294967295, %s1594_s29   ;;  %p1379_p0 = scmp.ge.s32.totalorder %s1594_s29, 1  ;;  %s1594_s29 = sphi %s1688_s29, %s24_s29  }
   0x2   : > { %p419_p1 = scmp.lt.s32.totalorder %s1594_s29, 3 }
   0x4   : > { %p420_p2 = pnand %p1379_p0, %p419_p1 }
   0x5   : > { %p466_p3 = scmp.lt.s32.totalorder (!%p420_p2), %s1375_s30, 1  ;;  %vm481_vm0 = vcmask (!%p420_p2), 261120   ;;  %v1554_v7 = vld [vmem:[%s1868_s4] sm:$0xff] (!%p420_p2)   ;;  %v1596_v8 = vmov (!%p420_p2), 0.0   ;;  %vm1597_vm1 = vmmov (!%p420_p2), 0   ;;  %v1555_v9 = vld [vmem:[%s1868_s4 + $0x8] sm:$0xff] (!%p420_p2)   ;;  %v578_v38 = vlaneseq (!%p420_p2) }
   0x6   : > { %423 = sbr.rel (%p420_p2) target bundleno = 2593 (0xa21), region = 76  ;;  %1445 = vmatprep.subr.bf16.mxu0 (!%p420_p2), %v1596_v8  ;;  %1449 = vmatprep.mubr.msk.bf16.mxu0 (!%p420_p2), %vm1597_vm1, %v1596_v8  ;;  %v1382_v14 = vld [vmem:[%s1866_s2] ss:$0 sm:$0xff] (!%p420_p2)  ;;  %s1598_s16 = smov (!%p420_p2), 120   ;;  %vm597_vm2 = vcmask (!%p420_p2), 64512   ;;  %vm661_vm4 = vcmask (!%p420_p2), 1043456  }
   0x7   : > { %1446 = vmatpush3.bf16.msra.mxu0 (!%p420_p2), %v1554_v7  ;;  %1453 = vmatprep.subr.bf16.mxu1 (!%p420_p2), %v1596_v8  ;;  %v1383_v16 = vld [vmem:[%s1867_s3] ss:$0 sm:$0xff] (!%p420_p2)  ;;  %s1599_s17 = smov (!%p420_p2), 96   ;;  %s1601_s19 = smov (!%p420_p2), 80   ;;  %v579_v40 = vshrl.u32 (!%p420_p2), %v578_v38, 7  ;;  %v581_v42 = vand.u32 (!%p420_p2), 127, %v578_v38 }
   0x8   : > { %1447 = vmatprep.subr.bf16.mxu0 (!%p420_p2), %v1596_v8  ;;  %1455 = vmatprep.mubr.msk.bf16.mxu1 (!%p420_p2), %vm1597_vm1, %v1596_v8  ;;  %v1384_v20 = vld [vmem:[%s1869_s5] ss:$0 sm:$0xff] (!%p420_p2)  ;;  %s1602_s20 = smov (!%p420_p2), 112   ;;  %s1603_s21 = smov (!%p420_p2), 72   ;;  %v1605_v46 = vmov (!%p420_p2), -1e+09  }
   0x9   : > { %s1604_s22 = smov (!%p420_p2), 104   ;;  %v589_v44 = vsub.s32 (!%p420_p2), 0, %v579_v40  ;;  %vm582_vm3 = vcmp.le.s32.totalorder (!%p420_p2), %v581_v42, %v579_v40  ;;  %s1606_s26 = smov (!%p420_p2), 64   ;;  %vm820_vm5 = vcmask (!%p420_p2), 130112   ;;  %vm936_vm6 = vcmask (!%p420_p2), 195712  }
   0xa   : > { %v583_v47 = vsel (!%p420_p2), %vm582_vm3, 0.0, %v1605_v46  ;;  %s1607_s27 = smov (!%p420_p2), 56   ;;  %s1608_s28 = smov (!%p420_p2), 48   ;;  %vm1052_vm7 = vcmask (!%p420_p2), 261312   ;;  %vm1267_vm8 = vcmask (!%p420_p2), 523264  }
   0xb   : > { %1448 = vmatpush3.bf16.msra.mxu0 (!%p420_p2), %v1555_v9  ;;  %s1612_s23 = smov (!%p420_p2), 24  }
   0xc   : > { %1459 = vmatprep.subr.bf16.mxu0 (!%p420_p2), %v1596_v8 }
   0xd   : > { %s1880_s30 = smov (!%p466_p3, %s1375_s30), 1 }
   0xe   : > { %s1380_s15 = sshll.u32 %s1880_s30, 3  ;;  %s472_s25 = scalar_lea.vmem %s1865_s1, %s1880_s30 }
   0xf   : > { %s469_s18 = scalar_lea.vmem %s1864_s0, %s1380_s15  ;;  %v577_v39 = vld [vmem:[%s472_s25] sm:$0x1] }
  0x10   : > { %v1704_v0 = vld [vmem:[%s469_s18] sm:$0xff]  ;;  %s1600_s18 = smov 88   ;;  %v584_v41 = vsub.f32 1.0, %v577_v39 }
  0x11   : > { %v482_v1 = vsel %vm481_vm0, %v1704_v0, 0.0 }
  0x12   : > { %483 = vadd.xlane.f32.xlu0 %v482_v1  ;;  %v585_v43 = vmul.f32 -1e+09, %v584_v41 }
  0x14   : > { %v590_v45 = vrot.slane %v585_v43, %v589_v44 }
  0x16   : > { %v592_v48 = vadd.f32 %v590_v45, %v583_v47 }
  0x9f   : > { %v484_v2 = vpop.xlane.xlu0 %483 }
  0xa0   : > { %v486_v3 = vmul.f32 0.03125, %v484_v2 }
  0xa2   : > { %v487_v4 = vsub.f32 %v1704_v0, %v486_v3 }
  0xa4   : > { %v488_v5 = vmul.f32 %v487_v4, %v487_v4 }
  0xa6   : > { %v489_v6 = vsel %vm481_vm0, %v488_v5, 0.0 }
  0xa7   : > { %490 = vadd.xlane.f32.xlu0 %v489_v6 }
 0x134   : > { %v491_v10 = vpop.xlane.xlu0 %490 }
 0x135   : > { %v492_v11 = vmul.f32 0.03125, %v491_v10 }
 0x137   : > { %v493_v12 = vadd.f32 1e-05, %v492_v11 }
 0x139   : > { %1564 = vrsqrt.f32 %v493_v12 }
 0x143   : > { %v1565_v13 = vpop.eup %1564 }
 0x144   : > { %v495_v15 = vmul.f32 %v1565_v13, %v487_v4 }
 0x146   : > { %v502_v17 = vmul.f32 %v1382_v14, %v495_v15 }
 0x148   : > { %v509_v18 = vadd.f32 %v1383_v16, %v502_v17 }
 0x14a   : > { %v510_v19 = vpack.c.bf16 %v509_v18, %v509_v18 }
 0x14c   : > { %1450 = vmatmul.mubr.msk.bf16.vlgmr.msra.gmra.mrb[0].mxu0 %vm481_vm0, %v510_v19 }
 0x14d   : > { %1461 = vmatprep.mubr.msk.bf16.mxu0 %vm1597_vm1, %v1596_v8 }
 0x21f   : > { %v571_v21 = vpop.f32.mrb[0].mxu0 }
 0x220   : > { %v572_v22 = vadd.f32 %v1384_v20, %v571_v21  ;;  %v1451_v23 = vpop.f32.mrb[1].mxu0 }
 0x221   : > { %v574_v24 = vpop.f32.mrb[2].mxu0 }
 0x222   : > { %v1736_v25 = vpack.c.bf16 %v572_v22, %v572_v22  ;;  %v1452_v26 = vpop.f32.mrb[3].mxu0 }
 0x224   : > { %706 = vrot.lane.b32.xlu0 %v1736_v25, %s1598_s16  ;;  %595 = vrot.lane.b32.xlu1 %v1736_v25, %s1599_s17  ;;  %s1609_s16 = smov 40   ;;  %s1610_s17 = smov 8  }
 0x228   : > { %708 = vrot.lane.b32.xlu1 %v1736_v25, %s1600_s18 }
 0x22c   : > { %824 = vrot.lane.b32.xlu1 %v1736_v25, %s1601_s19 }
 0x230   : > { %822 = vrot.lane.b32.xlu1 %v1736_v25, %s1602_s20 }
 0x234   : > { %940 = vrot.lane.b32.xlu1 %v1736_v25, %s1603_s21 }
 0x238   : > { %938 = vrot.lane.b32.xlu1 %v1736_v25, %s1604_s22  ;;  %s1611_s22 = smov 16  }
 0x296   : > { %v596_v27 = vpop.permute.xlu1 %595  ;;  %v707_v32 = vpop.permute.xlu0 %706 }
 0x297   : > { %v602_v28 = vsel %vm597_vm2, %v596_v27, 0 }
 0x298   : > { %1454 = vmatpush3.bf16.xpose.msra.mxu1 %v602_v28 }
 0x299   : > { %1465 = vmatprep.subr.bf16.mxu1 %v1596_v8 }
 0x29a   : > { %v709_v29 = vpop.permute.xlu1 %708 }
 0x29b   : > { %v714_v30 = vsel %vm597_vm2, %v709_v29, 0 }
 0x29e   : > { %v825_v31 = vpop.permute.xlu1 %824 }
 0x29f   : > { %1456 = vmatmul.mubr.msk.bf16.vlgmr.msra.gmra.mrb[0].mxu1 %vm597_vm2, %v1736_v25  ;;  %v830_v34 = vsel %vm597_vm2, %v825_v31, 0 }
 0x2a0   : > { %1466 = vmatpush3.bf16.xpose.msra.mxu1 %v714_v30  ;;  %1467 = vmatprep.mubr.msk.bf16.mxu1 %vm1597_vm1, %v1596_v8 }
 0x2a1   : > { %1477 = vmatprep.subr.bf16.mxu1 %v1596_v8 }
 0x2a2   : > { %v823_v33 = vpop.permute.xlu1 %822 }
 0x2a6   : > { %v941_v35 = vpop.permute.xlu1 %940 }
 0x2a7   : > { %1468 = vmatmul.mubr.msk.bf16.vlgmr.msra.gmra.mrb[4].mxu1 %vm597_vm2, %v707_v32  ;;  %v946_v36 = vsel %vm597_vm2, %v941_v35, 0 }
 0x2a8   : > { %1478 = vmatpush3.bf16.xpose.msra.mxu1 %v830_v34  ;;  %1479 = vmatprep.mubr.msk.bf16.mxu1 %vm1597_vm1, %v1596_v8 }
 0x2a9   : > { %1489 = vmatprep.subr.bf16.mxu1 %v1596_v8 }
 0x2aa   : > { %v939_v37 = vpop.permute.xlu1 %938 }
 0x2af   : > { %1480 = vmatmul.mubr.msk.bf16.vlgmr.msra.gmra.mrb[8].mxu1 %vm597_vm2, %v823_v33 }
 0x2b0   : > { %1490 = vmatpush3.bf16.xpose.msra.mxu1 %v946_v36  ;;  %1491 = vmatprep.mubr.msk.bf16.mxu1 %vm1597_vm1, %v1596_v8 }
 0x2b1   : > { %1501 = vmatprep.subr.bf16.mxu1 %v1596_v8 }
 0x2b7   : > { %1492 = vmatmul.mubr.msk.bf16.vlgmr.msra.gmra.mrb[12].mxu1 %vm597_vm2, %v939_v37 }
 0x2b8   : > { %1505 = vmatprep.mubr.msk.bf16.mxu1 %vm1597_vm1, %v1596_v8 }
 0x372   : > { %v638_v49 = vpop.f32.mrb[0].mxu1 }
 0x373   : > { %v639_v50 = vadd.f32 %v638_v49, %v592_v48  ;;  %v1457_v51 = vpop.f32.mrb[1].mxu1 }
 0x374   : > { %v641_v52 = vpop.f32.mrb[2].mxu1 }
 0x375   : > { %v1458_v53 = vpop.f32.mrb[3].mxu1  ;;  %v644_v54 = vsel %vm597_vm2, %v639_v50, -inf }
 0x376   : > { %645 = vmax.xlane.f32.xlu1 %v644_v54 }
 0x37a   : > { %v750_v55 = vpop.f32.mrb[4].mxu1 }
 0x37b   : > { %v751_v56 = vadd.f32 %v750_v55, %v592_v48  ;;  %v1469_v57 = vpop.f32.mrb[5].mxu1 }
 0x37c   : > { %v753_v58 = vpop.f32.mrb[6].mxu1 }
 0x37d   : > { %v1470_v59 = vpop.f32.mrb[7].mxu1  ;;  %v756_v60 = vsel %vm597_vm2, %v751_v56, -inf }
 0x37e   : > { %757 = vmax.xlane.f32.xlu0 %v756_v60 }
 0x382   : > { %v866_v61 = vpop.f32.mrb[8].mxu1 }
 0x383   : > { %v867_v62 = vadd.f32 %v866_v61, %v592_v48  ;;  %v1481_v63 = vpop.f32.mrb[9].mxu1 }
 0x384   : > { %v869_v1 = vpop.f32.mrb[10].mxu1  ;;  %v1556_v63 = vld [vmem:[%s1870_s6] sm:$0xff]  }
 0x385   : > { %v1482_v2 = vpop.f32.mrb[11].mxu1  ;;  %v872_v3 = vsel %vm597_vm2, %v867_v62, -inf  ;;  %1502 = vmatpush3.bf16.msra.mxu1 %v1556_v63  ;;  %v1557_v1 = vld [vmem:[%s1870_s6 + $0x8] sm:$0xff]  }
 0x386   : > { %873 = vmax.xlane.f32.xlu1 %v872_v3  ;;  %1503 = vmatprep.subr.bf16.mxu1 %v1596_v8 }
 0x389   : > { %1504 = vmatpush3.bf16.msra.mxu1 %v1557_v1 }
 0x38a   : > { %v982_v4 = vpop.f32.mrb[12].mxu1  ;;  %1517 = vmatprep.subr.bf16.mxu1 %v1596_v8 }
 0x38b   : > { %v983_v5 = vadd.f32 %v982_v4, %v592_v48  ;;  %v1493_v6 = vpop.f32.mrb[13].mxu1 }
 0x38c   : > { %v985_v7 = vpop.f32.mrb[14].mxu1 }
 0x38d   : > { %v1494_v9 = vpop.f32.mrb[15].mxu1  ;;  %v988_v10 = vsel %vm597_vm2, %v983_v5, -inf }
 0x38e   : > { %989 = vmax.xlane.f32.xlu0 %v988_v10 }
 0x403   : > { %v646_v11 = vpop.xlane.xlu1 %645 }
 0x404   : > { %v647_v12 = vsub.f32 %v639_v50, %v646_v11 }
 0x406   : > { %v648_v13 = vmul.f32 1.442695, %v647_v12 }
 0x408   : > { %1566 = vpow2.f32 %v648_v13 }
 0x40b   : > { %v758_v14 = vpop.xlane.xlu0 %757 }
 0x40c   : > { %v759_v15 = vsub.f32 %v751_v56, %v758_v14 }
 0x40e   : > { %v760_v16 = vmul.f32 1.442695, %v759_v15 }
 0x410   : > { %1568 = vpow2.f32 %v760_v16  ;;  %v1396_v16 = vld [vmem:[%s1871_s7] ss:$0 sm:$0xff] }
 0x412   : > { %v1567_v17 = vpop.eup %1566 }
 0x413   : > { %v650_v18 = vsel %vm597_vm2, %v1567_v17, 0.0  ;;  %v874_v27 = vpop.xlane.xlu1 %873 }
 0x414   : > { %651 = vadd.xlane.f32.xlu1 %v650_v18  ;;  %v875_v28 = vsub.f32 %v867_v62, %v874_v27 }
 0x416   : > { %v876_v29 = vmul.f32 1.442695, %v875_v28 }
 0x41a   : > { %v1569_v19 = vpop.eup %1568 }
 0x41b   : > { %v990_v20 = vpop.xlane.xlu0 %989  ;;  %v762_v21 = vsel %vm597_vm2, %v1569_v19, 0.0 }
 0x41c   : > { %v991_v22 = vsub.f32 %v983_v5, %v990_v20  ;;  %763 = vadd.xlane.f32.xlu0 %v762_v21 }
 0x41e   : > { %v992_v23 = vmul.f32 1.442695, %v991_v22 }
 0x420   : > { %1570 = vpow2.f32 %v992_v23 }
 0x421   : > { %1572 = vpow2.f32 %v876_v29 }
 0x425   : > { %656 = vrot.lane.b32.xlu1 %v1736_v25, %s1606_s26 }
 0x42a   : > { %v1571_v24 = vpop.eup %1570 }
 0x42b   : > { %v994_v26 = vsel %vm597_vm2, %v1571_v24, 0.0  ;;  %v1573_v30 = vpop.eup %1572 }
 0x42c   : > { %995 = vadd.xlane.f32.xlu0 %v994_v26  ;;  %v878_v31 = vsel %vm597_vm2, %v1573_v30, 0.0 }
 0x442   : > { %768 = vrot.lane.b32.xlu0 %v1736_v25, %s1607_s27 }
 0x449   : > { %879 = vadd.xlane.f32.xlu1 %v878_v31 }
 0x45a   : > { %884 = vrot.lane.b32.xlu1 %v1736_v25, %s1608_s28 }
 0x45e   : > { %1000 = vrot.lane.b32.xlu1 %v1736_v25, %s1609_s16 }
 0x4a1   : > { %v652_v32 = vpop.xlane.xlu1 %651 }
 0x4a2   : > { %1574 = vrcp.f32 %v652_v32 }
 0x4a5   : > { %v657_v33 = vpop.permute.xlu1 %656 }
 0x4a6   : > { %v663_v34 = vsel %vm661_vm4, %v657_v33, 0 }
 0x4a7   : > { %1460 = vmatpush3.bf16.msra.mxu0 %v663_v34 }
 0x4a8   : > { %1471 = vmatprep.subr.bf16.mxu0 %v1596_v8 }
 0x4a9   : > { %v764_v36 = vpop.xlane.xlu0 %763 }
 0x4aa   : > { %1576 = vrcp.f32 %v764_v36 }
 0x4ac   : > { %v1575_v35 = vpop.eup %1574 }
 0x4ad   : > { %v654_v37 = vmul.f32 %v1575_v35, %v1567_v17  ;;  %v1400_v35 = vld [vmem:[%s1872_s8] ss:$0 sm:$0xff] }
 0x4af   : > { %v655_v38 = vpack.c.bf16 %v654_v37, %v654_v37  ;;  %v1401_v37 = vld [vmem:[%s1873_s9] ss:$0 sm:$0xff] }
 0x4b1   : > { %1462 = vmatmul.mubr.msk.bf16.vlgmr.msra.gmra.mrb[4].mxu0 %vm597_vm2, %v655_v38 }
 0x4b2   : > { %1473 = vmatprep.mubr.msk.bf16.mxu0 %vm1597_vm1, %v1596_v8 }
 0x4b4   : > { %v1577_v25 = vpop.eup %1576 }
 0x4b5   : > { %v766_v40 = vmul.f32 %v1577_v25, %v1569_v19 }
 0x4b7   : > { %v767_v43 = vpack.c.bf16 %v766_v40, %v766_v40  ;;  %v1560_v40 = vld [vmem:[%s1876_s12] sm:$0xff]  }
 0x4b9   : > { %v996_v39 = vpop.xlane.xlu0 %995 }
 0x4bd   : > { %v769_v41 = vpop.permute.xlu0 %768 }
 0x4be   : > { %v774_v42 = vsel %vm661_vm4, %v769_v41, 0  ;;  %v1561_v41 = vld [vmem:[%s1876_s12 + $0x8] sm:$0xff]  }
 0x4bf   : > { %1472 = vmatpush3.bf16.msra.mxu0 %v774_v42  ;;  %v1562_v42 = vld [vmem:[%s1876_s12 + $0x10] sm:$0xff]  }
 0x4c0   : > { %1483 = vmatprep.subr.bf16.mxu0 %v1596_v8 }
 0x4c2   : > { %1474 = vmatmul.mubr.msk.bf16.vlgmr.msra.gmra.mrb[8].mxu0 %vm597_vm2, %v767_v43  ;;  %v1563_v43 = vld [vmem:[%s1876_s12 + $0x18] sm:$0xff]  }
 0x4c3   : > { %1485 = vmatprep.mubr.msk.bf16.mxu0 %vm1597_vm1, %v1596_v8 }
 0x4d6   : > { %v880_v44 = vpop.xlane.xlu1 %879 }
 0x4d7   : > { %1578 = vrcp.f32 %v880_v44  ;;  %v1402_v44 = vld [vmem:[%s1875_s11] ss:$0 sm:$0xff] }
 0x4d8   : > { %1580 = vrcp.f32 %v996_v39 }
 0x4da   : > { %v885_v45 = vpop.permute.xlu1 %884 }
 0x4db   : > { %v890_v46 = vsel %vm661_vm4, %v885_v45, 0 }
 0x4dc   : > { %1484 = vmatpush3.bf16.msra.mxu0 %v890_v46 }
 0x4dd   : > { %1495 = vmatprep.subr.bf16.mxu0 %v1596_v8 }
 0x4de   : > { %v1001_v49 = vpop.permute.xlu1 %1000 }
 0x4df   : > { %v1006_v52 = vsel %vm661_vm4, %v1001_v49, 0 }
 0x4e1   : > { %v1579_v47 = vpop.eup %1578 }
 0x4e2   : > { %v882_v48 = vmul.f32 %v1579_v47, %v1573_v30  ;;  %v1581_v51 = vpop.eup %1580  ;;  %v1558_v30 = vld [vmem:[%s1874_s10] sm:$0xff]  }
 0x4e3   : > { %v998_v53 = vmul.f32 %v1581_v51, %v1571_v24 }
 0x4e4   : > { %v883_v50 = vpack.c.bf16 %v882_v48, %v882_v48 }
 0x4e5   : > { %v999_v54 = vpack.c.bf16 %v998_v53, %v998_v53 }
 0x4e6   : > { %1486 = vmatmul.mubr.msk.bf16.vlgmr.msra.gmra.mrb[12].mxu0 %vm597_vm2, %v883_v50 }
 0x4e7   : > { %1496 = vmatpush3.bf16.msra.mxu0 %v1006_v52  ;;  %1497 = vmatprep.mubr.msk.bf16.mxu0 %vm1597_vm1, %v1596_v8 }
 0x4e8   : > { %1509 = vmatprep.subr.bf16.mxu0 %v1596_v8 }
 0x4ee   : > { %1498 = vmatmul.mubr.msk.bf16.vlgmr.msra.gmra.mrb[16].mxu0 %vm597_vm2, %v999_v54 }
 0x4ef   : > { %1513 = vmatprep.mubr.msk.bf16.mxu0 %vm1597_vm1, %v1596_v8  ;;  %1510 = vmatpush3.bf16.msra.mxu0 %v1558_v30 }
 0x4f0   : > { %1511 = vmatprep.subr.bf16.mxu0 %v1596_v8 }
 0x584   : > { %v699_v55 = vpop.f32.mrb[4].mxu0 }
 0x585   : > { %705 = vst.msk [vmem:[#allocation2] sm:$0xff] %vm597_vm2, %v699_v55  ;;  %v1463_v56 = vpop.f32.mrb[5].mxu0 }
 0x586   : > { %v702_v57 = vpop.f32.mrb[6].mxu0  ;;  %v1407_v56 = vld [vmem:[%s1877_s13] ss:$0 sm:$0xff] }
 0x587   : > { %v1464_v58 = vpop.f32.mrb[7].mxu0 }
 0x595   : > { %v810_v59 = vpop.f32.mrb[8].mxu0 }
 0x596   : > { %817 = vrot.lane.b32.xlu0 %v810_v59, %s1610_s17  ;;  %v1475_v60 = vpop.f32.mrb[9].mxu0 }
 0x597   : > { %v813_v61 = vpop.f32.mrb[10].mxu0 }
 0x598   : > { %v1476_v62 = vpop.f32.mrb[11].mxu0 }
 0x5b9   : > { %v926_v2 = vpop.f32.mrb[12].mxu0 }
 0x5ba   : > { %933 = vrot.lane.b32.xlu1 %v926_v2, %s1611_s22  ;;  %v1487_v3 = vpop.f32.mrb[13].mxu0  ;;  %s476_s22 = scalar_lea.vmem %s1878_s14, %s1380_s15 }
 0x5bb   : > { %v929_v4 = vpop.f32.mrb[14].mxu0 }
 0x5bc   : > { %v1488_v5 = vpop.f32.mrb[15].mxu0 }
 0x5c1   : > { %v1042_v6 = vpop.f32.mrb[16].mxu0 }
 0x5c2   : > { %1049 = vrot.lane.b32.xlu0 %v1042_v6, %s1612_s23  ;;  %v1499_v7 = vpop.f32.mrb[17].mxu0 }
 0x5c3   : > { %v1045_v9 = vpop.f32.mrb[18].mxu0 }
 0x5c4   : > { %v1500_v10 = vpop.f32.mrb[19].mxu0 }
 0x608   : > { %v818_v11 = vpop.permute.xlu0 %817 }
 0x609   : > { %821 = vst.msk [vmem:[#allocation2] sm:$0xff] %vm820_vm5, %v818_v11 }
 0x62c   : > { %v934_v12 = vpop.permute.xlu1 %933 }
 0x62d   : > { %937 = vst.msk [vmem:[#allocation2] sm:$0xff] %vm936_vm6, %v934_v12 }
 0x634   : > { %v1050_v13 = vpop.permute.xlu0 %1049 }
 0x635   : > { %1053 = vst.msk [vmem:[#allocation2] sm:$0xff] %vm1052_vm7, %v1050_v13 }
 0x63c   : > { %v1054_v14 = vld [vmem:[#allocation2] sm:$0xff] }
 0x63d   : > { %v1055_v15 = vpack.c.bf16 %v1054_v14, %v1054_v14 }
 0x63f   : > { %1506 = vmatmul.mubr.msk.bf16.vlgmr.msra.gmra.mrb[16].mxu1 %vm481_vm0, %v1055_v15 }
 0x640   : > { %1525 = vmatprep.mubr.msk.bf16.mxu1 %vm1597_vm1, %v1596_v8  ;;  %1518 = vmatpush3.bf16.msra.mxu1 %v1560_v40 }
 0x641   : > { %1519 = vmatprep.subr.bf16.mxu1 %v1596_v8 }
 0x644   : > { %1520 = vmatpush3.bf16.msra.mxu1 %v1561_v41 }
 0x645   : > { %1521 = vmatprep.subr.bf16.mxu1 %v1596_v8 }
 0x648   : > { %1522 = vmatpush3.bf16.msra.mxu1 %v1562_v42 }
 0x649   : > { %1523 = vmatprep.subr.bf16.mxu1 %v1596_v8 }
 0x64c   : > { %1524 = vmatpush3.bf16.msra.mxu1 %v1563_v43 }
 0x712   : > { %v1116_v17 = vpop.f32.mrb[16].mxu1 }
 0x713   : > { %v1117_v18 = vadd.f32 %v1396_v16, %v1116_v17  ;;  %v1507_v19 = vpop.f32.mrb[17].mxu1 }
 0x714   : > { %v1119_v20 = vpop.f32.mrb[18].mxu1 }
 0x715   : > { %v1122_v21 = vadd.f32 %v1117_v18, %v1704_v0  ;;  %v1508_v22 = vpop.f32.mrb[19].mxu1  ;;  %v1559_v0 = vld [vmem:[%s1874_s10 + $0x8] sm:$0xff]  }
 0x716   : > { %1512 = vmatpush3.bf16.msra.mxu0 %v1559_v0 }
 0x717   : > { %v1125_v23 = vsel %vm481_vm0, %v1122_v21, 0.0 }
 0x718   : > { %1126 = vadd.xlane.f32.xlu1 %v1125_v23 }
 0x7a5   : > { %v1127_v24 = vpop.xlane.xlu1 %1126 }
 0x7a6   : > { %v1128_v26 = vmul.f32 0.03125, %v1127_v24 }
 0x7a8   : > { %v1129_v27 = vsub.f32 %v1122_v21, %v1128_v26 }
 0x7aa   : > { %v1130_v28 = vmul.f32 %v1129_v27, %v1129_v27 }
 0x7ac   : > { %v1131_v29 = vsel %vm481_vm0, %v1130_v28, 0.0 }
 0x7ad   : > { %1132 = vadd.xlane.f32.xlu0 %v1131_v29 }
 0x83a   : > { %v1133_v31 = vpop.xlane.xlu0 %1132 }
 0x83b   : > { %v1134_v32 = vmul.f32 0.03125, %v1133_v31 }
 0x83d   : > { %v1135_v33 = vadd.f32 1e-05, %v1134_v32 }
 0x83f   : > { %1582 = vrsqrt.f32 %v1135_v33 }
 0x849   : > { %v1583_v34 = vpop.eup %1582 }
 0x84a   : > { %v1137_v36 = vmul.f32 %v1583_v34, %v1129_v27 }
 0x84c   : > { %v1144_v38 = vmul.f32 %v1400_v35, %v1137_v36 }
 0x84e   : > { %v1151_v25 = vadd.f32 %v1401_v37, %v1144_v38 }
 0x850   : > { %v1152_v39 = vpack.c.bf16 %v1151_v25, %v1151_v25 }
 0x852   : > { %1514 = vmatmul.mubr.msk.bf16.vlgmr.msra.gmra.mrb[20].mxu0 %vm481_vm0, %v1152_v39 }
 0x925   : > { %v1213_v45 = vpop.f32.mrb[20].mxu0 }
 0x926   : > { %v1214_v46 = vadd.f32 %v1402_v44, %v1213_v45  ;;  %v1515_v47 = vpop.f32.mrb[21].mxu0 }
 0x927   : > { %v1216_v48 = vpop.f32.mrb[22].mxu0 }
 0x928   : > { %v1406_v49 = vmul.f32 -1.702, %v1214_v46  ;;  %v1516_v50 = vpop.f32.mrb[23].mxu0 }
 0x92a   : > { %v1221_v51 = vmul.f32 1.442695, %v1406_v49 }
 0x92c   : > { %1584 = vpow2.f32 %v1221_v51 }
 0x936   : > { %v1585_v52 = vpop.eup %1584 }
 0x937   : > { %v1223_v8 = vadd.f32 1.0, %v1585_v52 }
 0x939   : > { %1586 = vrcp.f32 %v1223_v8 }
 0x943   : > { %v1587_v53 = vpop.eup %1586 }
 0x944   : > { %v1226_v54 = vmul.f32 %v1587_v53, %v1214_v46 }
 0x946   : > { %v1227_v55 = vpack.c.bf16 %v1226_v54, %v1226_v54 }
 0x948   : > { %1526 = vmatmul.mubr.msk.bf16.vlgmr.msra.gmra.mrb[20].mxu1 %vm1267_vm8, %v1227_v55 }
 0xa1b   : > { %v1305_v57 = vpop.f32.mrb[20].mxu1 }
 0xa1c   : > { %v1306_v58 = vadd.f32 %v1407_v56, %v1305_v57  ;;  %v1527_v59 = vpop.f32.mrb[21].mxu1 }
 0xa1d   : > { %v1308_v60 = vpop.f32.mrb[22].mxu1 }
 0xa1e   : > { %v1311_v61 = vadd.f32 %v1306_v58, %v1122_v21  ;;  %v1528_v62 = vpop.f32.mrb[23].mxu1 }
 0xa20   : > { %1312 = vst.msk [vmem:[%s476_s22] sm:$0xff] %vm481_vm0, %v1311_v61 }
 0xa21 PF: > { %s24_s29 = sadd.s32 1, %s1594_s29  }
 0xa22   : > { %p21_p4 = scmp.ge.s32.totalorder %s24_s29, 4  }
 0xa24   :  { %23 = sbr.rel (!%p21_p4) target bundleno = 1 (0x1), region = 109 }

</bundles_post_ra>
